<compile_context>
chip_gen: v7x
topology: tpu7x:2x2x1
jax: 0.10.0
libtpu: 0.0.40
codegen_flags: <defaults>
</compile_context>

<pallas_src>
import jax
import jax.numpy as jnp
import numpy as np
from jax.experimental import pallas as pl
from jax.experimental.pallas import tpu as pltpu

_K = 5  # Conv1d kernel size (padding = 2)


def _elu(x):
    return jnp.where(x > 0, x, jnp.exp(jnp.minimum(x, 0.0)) - 1.0)


def _round_up(n, m):
    return (n + m - 1) // m * m


# ----------------------------------------------------------------------------
# Fused forward builder (static configuration captured in closures).
# ----------------------------------------------------------------------------
def build_forward(B, C_in, L, conv_dims, hidden_dim, num_layers, out_dim=4):
    n_conv = len(conv_dims)
    H = hidden_dim

    # Static conv-shape bookkeeping: (input length, in channels, out channels) per block.
    conv_shapes = []
    Lg, Cg = L, C_in
    for D in conv_dims:
        assert Lg % 2 == 0, "length must stay even through every conv block"
        conv_shapes.append((Lg, Cg, D))
        Lg, Cg = Lg // 2, D
    T, C_last = Lg, Cg                    # RNN sequence length / RNN input width

    Wmax = max(list(conv_dims) + [H, out_dim])   # lane width of both packed slabs
    W_ALIGN = 16                                  # bf16 sublane-pack friendly row alignment

    # ---------- packed bf16 weight slab: static row offsets (all MXU operands) ----------
    w_off, tap_rows = {}, {}
    row = 0
    for g, (Lg_, Cg_, Dg_) in enumerate(conv_shapes):
        tr = _round_up(Cg_, W_ALIGN)
        tap_rows[g] = tr
        w_off[("conv", g)] = row
        row += _K * tr
    for l in range(num_layers):
        d_in = C_last if l == 0 else H
        w_off[("w_ih", l)] = row; row += _round_up(d_in, W_ALIGN)
        w_off[("w_hh", l)] = row; row += _round_up(H, W_ALIGN)
    w_off["w_out"] = row; row += _round_up(H, W_ALIGN)
    W_rows = _round_up(row, W_ALIGN)

    # ---------- packed f32 vector slab (biases, BN scale/shift): one row each ----------
    v_off = {}
    vrow = 0
    for g in range(n_conv):
        v_off[("cb", g)] = vrow; vrow += 1
        v_off[("sc", g)] = vrow; vrow += 1
        v_off[("sh", g)] = vrow; vrow += 1
    for l in range(num_layers):
        v_off[("rb", l)] = vrow; vrow += 1
    v_off["ob"] = vrow; vrow += 1
    V_rows = _round_up(vrow, 8)

    # ------------------------------- the fused kernel -------------------------------
    def kernel(x_ref, wpk_ref, vpk_ref, o_ref, *y_scr):
        # ----------------------- conv stack -----------------------
        # Per batch, per tap: acc += shifted(x) @ W_k (bf16 operands, f32 accumulation).
        cur = [x_ref[b] for b in range(B)]                       # list of (L0, C_in) f32
        for g, (Lg_, Cg_, Dg_) in enumerate(conv_shapes):
            base, tr = w_off[("conv", g)], tap_rows[g]
            taps = [wpk_ref[base + k * tr: base + k * tr + Cg_, :Dg_]   # bf16 (Cg_, Dg_)
                    for k in range(_K)]
            r = v_off[("cb", g)]; cb = vpk_ref[r:r + 1, :Dg_]           # f32 (1, Dg_)
            r = v_off[("sc", g)]; sc = vpk_ref[r:r + 1, :Dg_]
            r = v_off[("sh", g)]; sh = vpk_ref[r:r + 1, :Dg_]
            Lh = Lg_ // 2
            y_ref = y_scr[g]                                     # (B*Lg_, Dg_) f32 scratch
            nxt = []
            for b in range(B):
                xb = cur[b].astype(jnp.bfloat16)                 # (Lg_, Cg_)
                z1 = jnp.zeros((1, Cg_), jnp.bfloat16)
                z2 = jnp.zeros((2, Cg_), jnp.bfloat16)
                shifted = (                                      # shifted[k][i] = x[i + k - 2]
                    jnp.concatenate([z2, xb[:Lg_ - 2]], axis=0),
                    jnp.concatenate([z1, xb[:Lg_ - 1]], axis=0),
                    xb,
                    jnp.concatenate([xb[1:], z1], axis=0),
                    jnp.concatenate([xb[2:], z2], axis=0),
                )
                acc = jnp.zeros((Lg_, Dg_), jnp.float32)
                for k in range(_K):
                    acc = acc + jnp.dot(shifted[k], taps[k],
                                        preferred_element_type=jnp.float32)
                # Conv1d bias + ELU (f32), stored once per batch (8-aligned row range).
                y_ref[b * Lg_:(b + 1) * Lg_, :] = _elu(acc + cb)
                # MaxPool1d(2,2) via strided even/odd reads; eval-mode BatchNorm1d folded
                # to per-channel scale/shift. Dropout1d: identity in eval mode.
                ye = y_ref[pl.ds(b * Lg_, Lh, stride=2), :]
                yo = y_ref[pl.ds(b * Lg_ + 1, Lh, stride=2), :]
                nxt.append(jnp.maximum(ye, yo) * sc + sh)        # (Lh, Dg_) f32
            cur = nxt

        # RNN input sequence, time-major (T*B, C_last) -> contiguous per-timestep slices.
        x_tm = jnp.concatenate(
            [cur[b][t:t + 1, :] for t in range(T) for b in range(B)], axis=0)

        # ----------------------- RNN stack (tanh) -----------------------
        seq = x_tm
        h = jnp.zeros((B, H), jnp.float32)
        for l in range(num_layers):
            d_in = C_last if l == 0 else H
            r = w_off[("w_ih", l)]; w_ih = wpk_ref[r:r + d_in, :H]   # bf16, read once
            r = w_off[("w_hh", l)]; w_hh = wpk_ref[r:r + H, :H]      # bf16, stationary over t
            r = v_off[("rb", l)];   rb = vpk_ref[r:r + 1, :H]        # f32 (b_ih + b_hh)

            # Input projection hoisted out of the serial recurrence (time-major).
            xp = jnp.dot(seq.astype(jnp.bfloat16), w_ih,
                         preferred_element_type=jnp.float32) + rb    # (T*B, H)

            h = jnp.zeros((B, H), jnp.float32)
            outs = []
            for t in range(T):                                   # serial recurrence
                h = jnp.tanh(xp[t * B:(t + 1) * B, :]
                             + jnp.dot(h.astype(jnp.bfloat16), w_hh,
                                       preferred_element_type=jnp.float32))
                if l < num_layers - 1:
                    outs.append(h)
            if l < num_layers - 1:
                # One register-value concat per layer instead of T masked 2-row stores.
                seq = jnp.concatenate(outs, axis=0)
                # Inter-layer RNN dropout: identity in eval mode.

        # ----------------------- head: Linear(relu(h_T)) -----------------------
        r = w_off["w_out"]; w_out = wpk_ref[r:r + H, :out_dim]       # bf16
        r = v_off["ob"];    b_out = vpk_ref[r:r + 1, :out_dim]       # f32
        o_ref[...] = (jnp.dot(jnp.maximum(h, 0.0).astype(jnp.bfloat16), w_out,
                              preferred_element_type=jnp.float32) + b_out)

    # Tiny VMEM scratch: one pre-pool conv buffer per block (for the strided pool reads).
    scratch_shapes = [pltpu.VMEM((B * Lg_, Dg_), jnp.float32)
                      for (Lg_, Cg_, Dg_) in conv_shapes]

    vmem = pl.BlockSpec(memory_space=pltpu.MemorySpace.VMEM)
    call = pl.pallas_call(
        kernel,
        out_shape=jax.ShapeDtypeStruct((B, out_dim), jnp.float32),
        in_specs=[vmem, vmem, vmem],
        out_specs=vmem,
        scratch_shapes=scratch_shapes,
    )

    # ---------------- wrapper-side parameter packing (2 packed arrays) ----------------
    def pack_params(params):
        Wb = jnp.zeros((W_rows, Wmax), jnp.float32)
        for g, cp in enumerate(params["conv"]):
            base, tr = w_off[("conv", g)], tap_rows[g]
            _, cin, cout = cp["w"].shape
            for k in range(_K):
                Wb = Wb.at[base + k * tr: base + k * tr + cin, :cout].set(cp["w"][k])
        for l, rp in enumerate(params["rnn"]):
            d_in = rp["w_ih"].shape[0]
            r = w_off[("w_ih", l)]; Wb = Wb.at[r:r + d_in, :H].set(rp["w_ih"])
            r = w_off[("w_hh", l)]; Wb = Wb.at[r:r + H, :H].set(rp["w_hh"])
        r = w_off["w_out"]; Wb = Wb.at[r:r + H, :out_dim].set(params["w_out"])

        Vb = jnp.zeros((V_rows, Wmax), jnp.float32)
        for g, cp in enumerate(params["conv"]):
            cout = cp["b"].shape[-1]
            Vb = Vb.at[v_off[("cb", g)], :cout].set(cp["b"][0])
            Vb = Vb.at[v_off[("sc", g)], :cout].set(cp["scale"][0])
            Vb = Vb.at[v_off[("sh", g)], :cout].set(cp["shift"][0])
        for l, rp in enumerate(params["rnn"]):
            Vb = Vb.at[v_off[("rb", l)], :H].set(rp["b"][0])
        Vb = Vb.at[v_off["ob"], :out_dim].set(params["b_out"][0])
        return Wb.astype(jnp.bfloat16), Vb

    def forward(x_ncl, params):
        x = jnp.transpose(x_ncl, (0, 2, 1)).astype(jnp.float32)   # NCL -> (B, L, C)
        wpk, vpk = pack_params(params)
        return call(x, wpk, vpk)

    return forward


# ----------------------------------------------------------------------------
# Parameter init (deterministic, PyTorch-like fan-in uniform bounds).
# Conv weight stored as (K=5, Cin, Cout); RNN weights stored pre-transposed.
# ----------------------------------------------------------------------------
def init_params(key, input_dim, conv_dims, hidden_dim, num_layers, out_dim=4):
    params = {"conv": [], "rnn": []}
    keys = iter(jax.random.split(key, 64))
    prev = input_dim
    for dim in conv_dims:
        bound = 1.0 / np.sqrt(prev * 5)
        w = jax.random.uniform(next(keys), (5, prev, dim), jnp.float32, -bound, bound)
        b = jax.random.uniform(next(keys), (1, dim), jnp.float32, -bound, bound)
        # BatchNorm1d eval-mode at fresh init: gamma=1, beta=0, mean=0, var=1
        eps = 1e-5
        gamma = jnp.ones((1, dim), jnp.float32)
        beta = jnp.zeros((1, dim), jnp.float32)
        mean = jnp.zeros((1, dim), jnp.float32)
        var = jnp.ones((1, dim), jnp.float32)
        scale = gamma / jnp.sqrt(var + eps)
        shift = beta - mean * scale
        params["conv"].append(dict(w=w, b=b, scale=scale, shift=shift))
        prev = dim
    for layer in range(num_layers):
        d_in = prev if layer == 0 else hidden_dim
        bound = 1.0 / np.sqrt(hidden_dim)
        w_ih = jax.random.uniform(next(keys), (d_in, hidden_dim), jnp.float32, -bound, bound)
        w_hh = jax.random.uniform(next(keys), (hidden_dim, hidden_dim), jnp.float32, -bound, bound)
        b_ih = jax.random.uniform(next(keys), (1, hidden_dim), jnp.float32, -bound, bound)
        b_hh = jax.random.uniform(next(keys), (1, hidden_dim), jnp.float32, -bound, bound)
        params["rnn"].append(dict(w_ih=w_ih, w_hh=w_hh, b=b_ih + b_hh))
    bound = 1.0 / np.sqrt(hidden_dim)
    params["w_out"] = jax.random.uniform(next(keys), (hidden_dim, out_dim), jnp.float32, -bound, bound)
    params["b_out"] = jax.random.uniform(next(keys), (1, out_dim), jnp.float32, -bound, bound)
    return params


# ----------------------------------------------------------------------------
# Pure-JAX f32 reference (matches the PyTorch module in eval mode).
# ----------------------------------------------------------------------------
def forward_reference(x_ncl, params):
    x = jnp.transpose(x_ncl, (0, 2, 1)).astype(jnp.float32)
    for cp in params["conv"]:
        B, L, _ = x.shape
        xp = jnp.pad(x, ((0, 0), (2, 2), (0, 0)))
        y = sum(jnp.einsum("blc,cd->bld", xp[:, k:k + L, :], cp["w"][k]) for k in range(5))
        y = y + cp["b"]
        y = _elu(y)
        y = jnp.maximum(y[:, 0::2, :], y[:, 1::2, :])
        x = y * cp["scale"] + cp["shift"]
    seq = x
    for rp in params["rnn"]:
        B, T, _ = seq.shape
        H = rp["w_hh"].shape[0]
        h = jnp.zeros((B, H), jnp.float32)
        outs = []
        for t in range(T):
            h = jnp.tanh(seq[:, t, :] @ rp["w_ih"] + h @ rp["w_hh"] + rp["b"])
            outs.append(h)
        seq = jnp.stack(outs, axis=1)
    h_last = seq[:, -1, :]
    return jnp.maximum(h_last, 0.0) @ params["w_out"] + params["b_out"]


if __name__ == "__main__":
    B, C_in, L = 2, 4, 16
    conv_dims = [8, 16]
    hidden_dim = 32
    num_layers = 2

    key = jax.random.PRNGKey(0)
    pkey, xkey = jax.random.split(key)
    params = init_params(pkey, C_in, conv_dims, hidden_dim, num_layers)
    x = jax.random.normal(xkey, (B, C_in, L), jnp.float32)   # NCL, like PyTorch Conv1d input

    forward = jax.jit(build_forward(B, C_in, L, conv_dims, hidden_dim, num_layers))
    out = jax.block_until_ready(forward(x, params))

    ref = forward_reference(x, params)
    assert out.shape == (B, 4), out.shape
    # bf16 MXU operands (f32 accumulation) -> slightly relaxed tolerance vs. the f32 reference.
    np.testing.assert_allclose(np.asarray(out), np.asarray(ref), rtol=2e-2, atol=2e-2)
    print("KERNEL_OK")
</pallas_src>

<mosaic_0001>
module attributes {stable_mosaic.version = 11 : i64} {
  func.func @kernel(%arg0: memref<2x16x4xf32, #tpu.memory_space<vmem>>, %arg1: memref<304x32xbf16, #tpu.memory_space<vmem>>, %arg2: memref<16x32xf32, #tpu.memory_space<vmem>>, %arg3: memref<2x4xf32, #tpu.memory_space<vmem>>, %arg4: memref<32x8xf32, #tpu.memory_space<vmem>>, %arg5: memref<16x16xf32, #tpu.memory_space<vmem>>) attributes {dimension_semantics = [], scalar_prefetch = 0 : i64, scratch_operands = 2 : i64, tpu.core_type = #tpu.core_type<tc>} {
    %c0 = arith.constant 0 : index
    %c0_0 = arith.constant 0 : index
    %c0_1 = arith.constant 0 : index
    %0 = vector.load %arg0[%c0, %c0_0, %c0_1] : memref<2x16x4xf32, #tpu.memory_space<vmem>>, vector<1x16x4xf32>
    %1 = vector.shape_cast %0 : vector<1x16x4xf32> to vector<16x4xf32>
    %c1 = arith.constant 1 : index
    %c0_2 = arith.constant 0 : index
    %c0_3 = arith.constant 0 : index
    %2 = vector.load %arg0[%c1, %c0_2, %c0_3] : memref<2x16x4xf32, #tpu.memory_space<vmem>>, vector<1x16x4xf32>
    %3 = vector.shape_cast %2 : vector<1x16x4xf32> to vector<16x4xf32>
    %c0_4 = arith.constant 0 : index
    %c0_5 = arith.constant 0 : index
    %4 = vector.load %arg1[%c0_4, %c0_5] : memref<304x32xbf16, #tpu.memory_space<vmem>>, vector<4x8xbf16>
    %c16 = arith.constant 16 : index
    %c0_6 = arith.constant 0 : index
    %5 = vector.load %arg1[%c16, %c0_6] : memref<304x32xbf16, #tpu.memory_space<vmem>>, vector<4x8xbf16>
    %c32 = arith.constant 32 : index
    %c0_7 = arith.constant 0 : index
    %6 = vector.load %arg1[%c32, %c0_7] : memref<304x32xbf16, #tpu.memory_space<vmem>>, vector<4x8xbf16>
    %c48 = arith.constant 48 : index
    %c0_8 = arith.constant 0 : index
    %7 = vector.load %arg1[%c48, %c0_8] : memref<304x32xbf16, #tpu.memory_space<vmem>>, vector<4x8xbf16>
    %c64 = arith.constant 64 : index
    %c0_9 = arith.constant 0 : index
    %8 = vector.load %arg1[%c64, %c0_9] : memref<304x32xbf16, #tpu.memory_space<vmem>>, vector<4x8xbf16>
    %c0_10 = arith.constant 0 : index
    %c0_11 = arith.constant 0 : index
    %9 = vector.load %arg2[%c0_10, %c0_11] : memref<16x32xf32, #tpu.memory_space<vmem>>, vector<1x8xf32>
    %c1_12 = arith.constant 1 : index
    %c0_13 = arith.constant 0 : index
    %10 = vector.load %arg2[%c1_12, %c0_13] : memref<16x32xf32, #tpu.memory_space<vmem>>, vector<1x8xf32>
    %c2 = arith.constant 2 : index
    %c0_14 = arith.constant 0 : index
    %11 = vector.load %arg2[%c2, %c0_14] : memref<16x32xf32, #tpu.memory_space<vmem>>, vector<1x8xf32>
    %12 = arith.truncf %1 : vector<16x4xf32> to vector<16x4xbf16>
    %cst = arith.constant 0.000000e+00 : bf16
    %13 = vector.broadcast %cst : bf16 to vector<1x4xbf16>
    %cst_15 = arith.constant 0.000000e+00 : bf16
    %14 = vector.broadcast %cst_15 : bf16 to vector<2x4xbf16>
    %15 = vector.extract_strided_slice %12 {offsets = [0, 0], sizes = [14, 4], strides = [1, 1]} : vector<16x4xbf16> to vector<14x4xbf16>
    %16 = tpu.concatenate %14, %15 in 0 : vector<2x4xbf16>, vector<14x4xbf16> -> vector<16x4xbf16>
    %17 = vector.extract_strided_slice %12 {offsets = [0, 0], sizes = [15, 4], strides = [1, 1]} : vector<16x4xbf16> to vector<15x4xbf16>
    %18 = tpu.concatenate %13, %17 in 0 : vector<1x4xbf16>, vector<15x4xbf16> -> vector<16x4xbf16>
    %19 = vector.extract_strided_slice %12 {offsets = [1, 0], sizes = [15, 4], strides = [1, 1]} : vector<16x4xbf16> to vector<15x4xbf16>
    %20 = tpu.concatenate %19, %13 in 0 : vector<15x4xbf16>, vector<1x4xbf16> -> vector<16x4xbf16>
    %21 = vector.extract_strided_slice %12 {offsets = [2, 0], sizes = [14, 4], strides = [1, 1]} : vector<16x4xbf16> to vector<14x4xbf16>
    %22 = tpu.concatenate %21, %14 in 0 : vector<14x4xbf16>, vector<2x4xbf16> -> vector<16x4xbf16>
    %cst_16 = arith.constant 0.000000e+00 : f32
    %23 = vector.broadcast %cst_16 : f32 to vector<16x8xf32>
    %cst_17 = arith.constant dense<0.000000e+00> : vector<16x8xf32>
    %24 = tpu.matmul %16, %4, %cst_17 {dimension_numbers = #tpu.dot_dimension_numbers<[1], [0], [0], [1], [0, 0, 1, 1], [], []>} : vector<16x4xbf16>, vector<4x8xbf16>, vector<16x8xf32> -> vector<16x8xf32>
    %25 = arith.addf %23, %24 : vector<16x8xf32>
    %cst_18 = arith.constant dense<0.000000e+00> : vector<16x8xf32>
    %26 = tpu.matmul %18, %5, %cst_18 {dimension_numbers = #tpu.dot_dimension_numbers<[1], [0], [0], [1], [0, 0, 1, 1], [], []>} : vector<16x4xbf16>, vector<4x8xbf16>, vector<16x8xf32> -> vector<16x8xf32>
    %27 = arith.addf %25, %26 : vector<16x8xf32>
    %cst_19 = arith.constant dense<0.000000e+00> : vector<16x8xf32>
    %28 = tpu.matmul %12, %6, %cst_19 {dimension_numbers = #tpu.dot_dimension_numbers<[1], [0], [0], [1], [0, 0, 1, 1], [], []>} : vector<16x4xbf16>, vector<4x8xbf16>, vector<16x8xf32> -> vector<16x8xf32>
    %29 = arith.addf %27, %28 : vector<16x8xf32>
    %cst_20 = arith.constant dense<0.000000e+00> : vector<16x8xf32>
    %30 = tpu.matmul %20, %7, %cst_20 {dimension_numbers = #tpu.dot_dimension_numbers<[1], [0], [0], [1], [0, 0, 1, 1], [], []>} : vector<16x4xbf16>, vector<4x8xbf16>, vector<16x8xf32> -> vector<16x8xf32>
    %31 = arith.addf %29, %30 : vector<16x8xf32>
    %cst_21 = arith.constant dense<0.000000e+00> : vector<16x8xf32>
    %32 = tpu.matmul %22, %8, %cst_21 {dimension_numbers = #tpu.dot_dimension_numbers<[1], [0], [0], [1], [0, 0, 1, 1], [], []>} : vector<16x4xbf16>, vector<4x8xbf16>, vector<16x8xf32> -> vector<16x8xf32>
    %33 = arith.addf %31, %32 : vector<16x8xf32>
    %34 = vector.broadcast %9 : vector<1x8xf32> to vector<16x8xf32>
    %35 = arith.addf %33, %34 : vector<16x8xf32>
    %cst_22 = arith.constant 0.000000e+00 : f32
    %36 = vector.broadcast %cst_22 : f32 to vector<16x8xf32>
    %37 = arith.cmpf ogt, %35, %36 : vector<16x8xf32>
    %cst_23 = arith.constant 0.000000e+00 : f32
    %38 = vector.broadcast %cst_23 : f32 to vector<16x8xf32>
    %39 = arith.minimumf %35, %38 : vector<16x8xf32>
    %40 = math.exp %39 : vector<16x8xf32>
    %cst_24 = arith.constant 1.000000e+00 : f32
    %41 = vector.broadcast %cst_24 : f32 to vector<16x8xf32>
    %42 = arith.subf %40, %41 : vector<16x8xf32>
    %43 = arith.select %37, %35, %42 : vector<16x8xi1>, vector<16x8xf32>
    %c0_25 = arith.constant 0 : index
    %c0_26 = arith.constant 0 : index
    %44 = vector.load %arg4[%c0_25, %c0_26] : memref<32x8xf32, #tpu.memory_space<vmem>>, vector<16x8xf32>
    tpu.vector_store %arg4[%c0_25, %c0_26], %43 {strides = array<i32>} : memref<32x8xf32, #tpu.memory_space<vmem>>, vector<16x8xf32>,
    %c0_27 = arith.constant 0 : index
    %c0_28 = arith.constant 0 : index
    %45 = tpu.strided_load %arg4[%c0_27, %c0_28] {strides = array<i32: 2, 1>} : memref<32x8xf32, #tpu.memory_space<vmem>>, vector<8x8xf32>
    %c1_29 = arith.constant 1 : index
    %c0_30 = arith.constant 0 : index
    %46 = tpu.strided_load %arg4[%c1_29, %c0_30] {strides = array<i32: 2, 1>} : memref<32x8xf32, #tpu.memory_space<vmem>>, vector<8x8xf32>
    %47 = arith.maximumf %45, %46 : vector<8x8xf32>
    %48 = vector.broadcast %10 : vector<1x8xf32> to vector<8x8xf32>
    %49 = arith.mulf %47, %48 : vector<8x8xf32>
    %50 = vector.broadcast %11 : vector<1x8xf32> to vector<8x8xf32>
    %51 = arith.addf %49, %50 : vector<8x8xf32>
    %52 = arith.truncf %3 : vector<16x4xf32> to vector<16x4xbf16>
    %cst_31 = arith.constant 0.000000e+00 : bf16
    %53 = vector.broadcast %cst_31 : bf16 to vector<1x4xbf16>
    %cst_32 = arith.constant 0.000000e+00 : bf16
    %54 = vector.broadcast %cst_32 : bf16 to vector<2x4xbf16>
    %55 = vector.extract_strided_slice %52 {offsets = [0, 0], sizes = [14, 4], strides = [1, 1]} : vector<16x4xbf16> to vector<14x4xbf16>
    %56 = tpu.concatenate %54, %55 in 0 : vector<2x4xbf16>, vector<14x4xbf16> -> vector<16x4xbf16>
    %57 = vector.extract_strided_slice %52 {offsets = [0, 0], sizes = [15, 4], strides = [1, 1]} : vector<16x4xbf16> to vector<15x4xbf16>
    %58 = tpu.concatenate %53, %57 in 0 : vector<1x4xbf16>, vector<15x4xbf16> -> vector<16x4xbf16>
    %59 = vector.extract_strided_slice %52 {offsets = [1, 0], sizes = [15, 4], strides = [1, 1]} : vector<16x4xbf16> to vector<15x4xbf16>
    %60 = tpu.concatenate %59, %53 in 0 : vector<15x4xbf16>, vector<1x4xbf16> -> vector<16x4xbf16>
    %61 = vector.extract_strided_slice %52 {offsets = [2, 0], sizes = [14, 4], strides = [1, 1]} : vector<16x4xbf16> to vector<14x4xbf16>
    %62 = tpu.concatenate %61, %54 in 0 : vector<14x4xbf16>, vector<2x4xbf16> -> vector<16x4xbf16>
    %cst_33 = arith.constant 0.000000e+00 : f32
    %63 = vector.broadcast %cst_33 : f32 to vector<16x8xf32>
    %cst_34 = arith.constant dense<0.000000e+00> : vector<16x8xf32>
    %64 = tpu.matmul %56, %4, %cst_34 {dimension_numbers = #tpu.dot_dimension_numbers<[1], [0], [0], [1], [0, 0, 1, 1], [], []>} : vector<16x4xbf16>, vector<4x8xbf16>, vector<16x8xf32> -> vector<16x8xf32>
    %65 = arith.addf %63, %64 : vector<16x8xf32>
    %cst_35 = arith.constant dense<0.000000e+00> : vector<16x8xf32>
    %66 = tpu.matmul %58, %5, %cst_35 {dimension_numbers = #tpu.dot_dimension_numbers<[1], [0], [0], [1], [0, 0, 1, 1], [], []>} : vector<16x4xbf16>, vector<4x8xbf16>, vector<16x8xf32> -> vector<16x8xf32>
    %67 = arith.addf %65, %66 : vector<16x8xf32>
    %cst_36 = arith.constant dense<0.000000e+00> : vector<16x8xf32>
    %68 = tpu.matmul %52, %6, %cst_36 {dimension_numbers = #tpu.dot_dimension_numbers<[1], [0], [0], [1], [0, 0, 1, 1], [], []>} : vector<16x4xbf16>, vector<4x8xbf16>, vector<16x8xf32> -> vector<16x8xf32>
    %69 = arith.addf %67, %68 : vector<16x8xf32>
    %cst_37 = arith.constant dense<0.000000e+00> : vector<16x8xf32>
    %70 = tpu.matmul %60, %7, %cst_37 {dimension_numbers = #tpu.dot_dimension_numbers<[1], [0], [0], [1], [0, 0, 1, 1], [], []>} : vector<16x4xbf16>, vector<4x8xbf16>, vector<16x8xf32> -> vector<16x8xf32>
    %71 = arith.addf %69, %70 : vector<16x8xf32>
    %cst_38 = arith.constant dense<0.000000e+00> : vector<16x8xf32>
    %72 = tpu.matmul %62, %8, %cst_38 {dimension_numbers = #tpu.dot_dimension_numbers<[1], [0], [0], [1], [0, 0, 1, 1], [], []>} : vector<16x4xbf16>, vector<4x8xbf16>, vector<16x8xf32> -> vector<16x8xf32>
    %73 = arith.addf %71, %72 : vector<16x8xf32>
    %74 = vector.broadcast %9 : vector<1x8xf32> to vector<16x8xf32>
    %75 = arith.addf %73, %74 : vector<16x8xf32>
    %cst_39 = arith.constant 0.000000e+00 : f32
    %76 = vector.broadcast %cst_39 : f32 to vector<16x8xf32>
    %77 = arith.cmpf ogt, %75, %76 : vector<16x8xf32>
    %cst_40 = arith.constant 0.000000e+00 : f32
    %78 = vector.broadcast %cst_40 : f32 to vector<16x8xf32>
    %79 = arith.minimumf %75, %78 : vector<16x8xf32>
    %80 = math.exp %79 : vector<16x8xf32>
    %cst_41 = arith.constant 1.000000e+00 : f32
    %81 = vector.broadcast %cst_41 : f32 to vector<16x8xf32>
    %82 = arith.subf %80, %81 : vector<16x8xf32>
    %83 = arith.select %77, %75, %82 : vector<16x8xi1>, vector<16x8xf32>
    %c16_42 = arith.constant 16 : index
    %c0_43 = arith.constant 0 : index
    %84 = vector.load %arg4[%c16_42, %c0_43] : memref<32x8xf32, #tpu.memory_space<vmem>>, vector<16x8xf32>
    tpu.vector_store %arg4[%c16_42, %c0_43], %83 {strides = array<i32>} : memref<32x8xf32, #tpu.memory_space<vmem>>, vector<16x8xf32>,
    %c16_44 = arith.constant 16 : index
    %c0_45 = arith.constant 0 : index
    %85 = tpu.strided_load %arg4[%c16_44, %c0_45] {strides = array<i32: 2, 1>} : memref<32x8xf32, #tpu.memory_space<vmem>>, vector<8x8xf32>
    %c17 = arith.constant 17 : index
    %c0_46 = arith.constant 0 : index
    %86 = tpu.strided_load %arg4[%c17, %c0_46] {strides = array<i32: 2, 1>} : memref<32x8xf32, #tpu.memory_space<vmem>>, vector<8x8xf32>
    %87 = arith.maximumf %85, %86 : vector<8x8xf32>
    %88 = vector.broadcast %10 : vector<1x8xf32> to vector<8x8xf32>
    %89 = arith.mulf %87, %88 : vector<8x8xf32>
    %90 = vector.broadcast %11 : vector<1x8xf32> to vector<8x8xf32>
    %91 = arith.addf %89, %90 : vector<8x8xf32>
    %c80 = arith.constant 80 : index
    %c0_47 = arith.constant 0 : index
    %92 = vector.load %arg1[%c80, %c0_47] : memref<304x32xbf16, #tpu.memory_space<vmem>>, vector<8x16xbf16>
    %c96 = arith.constant 96 : index
    %c0_48 = arith.constant 0 : index
    %93 = vector.load %arg1[%c96, %c0_48] : memref<304x32xbf16, #tpu.memory_space<vmem>>, vector<8x16xbf16>
    %c112 = arith.constant 112 : index
    %c0_49 = arith.constant 0 : index
    %94 = vector.load %arg1[%c112, %c0_49] : memref<304x32xbf16, #tpu.memory_space<vmem>>, vector<8x16xbf16>
    %c128 = arith.constant 128 : index
    %c0_50 = arith.constant 0 : index
    %95 = vector.load %arg1[%c128, %c0_50] : memref<304x32xbf16, #tpu.memory_space<vmem>>, vector<8x16xbf16>
    %c144 = arith.constant 144 : index
    %c0_51 = arith.constant 0 : index
    %96 = vector.load %arg1[%c144, %c0_51] : memref<304x32xbf16, #tpu.memory_space<vmem>>, vector<8x16xbf16>
    %c3 = arith.constant 3 : index
    %c0_52 = arith.constant 0 : index
    %97 = vector.load %arg2[%c3, %c0_52] : memref<16x32xf32, #tpu.memory_space<vmem>>, vector<1x16xf32>
    %c4 = arith.constant 4 : index
    %c0_53 = arith.constant 0 : index
    %98 = vector.load %arg2[%c4, %c0_53] : memref<16x32xf32, #tpu.memory_space<vmem>>, vector<1x16xf32>
    %c5 = arith.constant 5 : index
    %c0_54 = arith.constant 0 : index
    %99 = vector.load %arg2[%c5, %c0_54] : memref<16x32xf32, #tpu.memory_space<vmem>>, vector<1x16xf32>
    %100 = arith.truncf %51 : vector<8x8xf32> to vector<8x8xbf16>
    %cst_55 = arith.constant 0.000000e+00 : bf16
    %101 = vector.broadcast %cst_55 : bf16 to vector<1x8xbf16>
    %cst_56 = arith.constant 0.000000e+00 : bf16
    %102 = vector.broadcast %cst_56 : bf16 to vector<2x8xbf16>
    %103 = vector.extract_strided_slice %100 {offsets = [0, 0], sizes = [6, 8], strides = [1, 1]} : vector<8x8xbf16> to vector<6x8xbf16>
    %104 = tpu.concatenate %102, %103 in 0 : vector<2x8xbf16>, vector<6x8xbf16> -> vector<8x8xbf16>
    %105 = vector.extract_strided_slice %100 {offsets = [0, 0], sizes = [7, 8], strides = [1, 1]} : vector<8x8xbf16> to vector<7x8xbf16>
    %106 = tpu.concatenate %101, %105 in 0 : vector<1x8xbf16>, vector<7x8xbf16> -> vector<8x8xbf16>
    %107 = vector.extract_strided_slice %100 {offsets = [1, 0], sizes = [7, 8], strides = [1, 1]} : vector<8x8xbf16> to vector<7x8xbf16>
    %108 = tpu.concatenate %107, %101 in 0 : vector<7x8xbf16>, vector<1x8xbf16> -> vector<8x8xbf16>
    %109 = vector.extract_strided_slice %100 {offsets = [2, 0], sizes = [6, 8], strides = [1, 1]} : vector<8x8xbf16> to vector<6x8xbf16>
    %110 = tpu.concatenate %109, %102 in 0 : vector<6x8xbf16>, vector<2x8xbf16> -> vector<8x8xbf16>
    %cst_57 = arith.constant 0.000000e+00 : f32
    %111 = vector.broadcast %cst_57 : f32 to vector<8x16xf32>
    %cst_58 = arith.constant dense<0.000000e+00> : vector<8x16xf32>
    %112 = tpu.matmul %104, %92, %cst_58 {dimension_numbers = #tpu.dot_dimension_numbers<[1], [0], [0], [1], [0, 0, 1, 1], [], []>} : vector<8x8xbf16>, vector<8x16xbf16>, vector<8x16xf32> -> vector<8x16xf32>
    %113 = arith.addf %111, %112 : vector<8x16xf32>
    %cst_59 = arith.constant dense<0.000000e+00> : vector<8x16xf32>
    %114 = tpu.matmul %106, %93, %cst_59 {dimension_numbers = #tpu.dot_dimension_numbers<[1], [0], [0], [1], [0, 0, 1, 1], [], []>} : vector<8x8xbf16>, vector<8x16xbf16>, vector<8x16xf32> -> vector<8x16xf32>
    %115 = arith.addf %113, %114 : vector<8x16xf32>
    %cst_60 = arith.constant dense<0.000000e+00> : vector<8x16xf32>
    %116 = tpu.matmul %100, %94, %cst_60 {dimension_numbers = #tpu.dot_dimension_numbers<[1], [0], [0], [1], [0, 0, 1, 1], [], []>} : vector<8x8xbf16>, vector<8x16xbf16>, vector<8x16xf32> -> vector<8x16xf32>
    %117 = arith.addf %115, %116 : vector<8x16xf32>
    %cst_61 = arith.constant dense<0.000000e+00> : vector<8x16xf32>
    %118 = tpu.matmul %108, %95, %cst_61 {dimension_numbers = #tpu.dot_dimension_numbers<[1], [0], [0], [1], [0, 0, 1, 1], [], []>} : vector<8x8xbf16>, vector<8x16xbf16>, vector<8x16xf32> -> vector<8x16xf32>
    %119 = arith.addf %117, %118 : vector<8x16xf32>
    %cst_62 = arith.constant dense<0.000000e+00> : vector<8x16xf32>
    %120 = tpu.matmul %110, %96, %cst_62 {dimension_numbers = #tpu.dot_dimension_numbers<[1], [0], [0], [1], [0, 0, 1, 1], [], []>} : vector<8x8xbf16>, vector<8x16xbf16>, vector<8x16xf32> -> vector<8x16xf32>
    %121 = arith.addf %119, %120 : vector<8x16xf32>
    %122 = vector.broadcast %97 : vector<1x16xf32> to vector<8x16xf32>
    %123 = arith.addf %121, %122 : vector<8x16xf32>
    %cst_63 = arith.constant 0.000000e+00 : f32
    %124 = vector.broadcast %cst_63 : f32 to vector<8x16xf32>
    %125 = arith.cmpf ogt, %123, %124 : vector<8x16xf32>
    %cst_64 = arith.constant 0.000000e+00 : f32
    %126 = vector.broadcast %cst_64 : f32 to vector<8x16xf32>
    %127 = arith.minimumf %123, %126 : vector<8x16xf32>
    %128 = math.exp %127 : vector<8x16xf32>
    %cst_65 = arith.constant 1.000000e+00 : f32
    %129 = vector.broadcast %cst_65 : f32 to vector<8x16xf32>
    %130 = arith.subf %128, %129 : vector<8x16xf32>
    %131 = arith.select %125, %123, %130 : vector<8x16xi1>, vector<8x16xf32>
    %c0_66 = arith.constant 0 : index
    %c0_67 = arith.constant 0 : index
    %132 = vector.load %arg5[%c0_66, %c0_67] : memref<16x16xf32, #tpu.memory_space<vmem>>, vector<8x16xf32>
    tpu.vector_store %arg5[%c0_66, %c0_67], %131 {strides = array<i32>} : memref<16x16xf32, #tpu.memory_space<vmem>>, vector<8x16xf32>,
    %c0_68 = arith.constant 0 : index
    %c0_69 = arith.constant 0 : index
    %133 = tpu.strided_load %arg5[%c0_68, %c0_69] {strides = array<i32: 2, 1>} : memref<16x16xf32, #tpu.memory_space<vmem>>, vector<4x16xf32>
    %c1_70 = arith.constant 1 : index
    %c0_71 = arith.constant 0 : index
    %134 = tpu.strided_load %arg5[%c1_70, %c0_71] {strides = array<i32: 2, 1>} : memref<16x16xf32, #tpu.memory_space<vmem>>, vector<4x16xf32>
    %135 = arith.maximumf %133, %134 : vector<4x16xf32>
    %136 = vector.broadcast %98 : vector<1x16xf32> to vector<4x16xf32>
    %137 = arith.mulf %135, %136 : vector<4x16xf32>
    %138 = vector.broadcast %99 : vector<1x16xf32> to vector<4x16xf32>
    %139 = arith.addf %137, %138 : vector<4x16xf32>
    %140 = arith.truncf %91 : vector<8x8xf32> to vector<8x8xbf16>
    %cst_72 = arith.constant 0.000000e+00 : bf16
    %141 = vector.broadcast %cst_72 : bf16 to vector<1x8xbf16>
    %cst_73 = arith.constant 0.000000e+00 : bf16
    %142 = vector.broadcast %cst_73 : bf16 to vector<2x8xbf16>
    %143 = vector.extract_strided_slice %140 {offsets = [0, 0], sizes = [6, 8], strides = [1, 1]} : vector<8x8xbf16> to vector<6x8xbf16>
    %144 = tpu.concatenate %142, %143 in 0 : vector<2x8xbf16>, vector<6x8xbf16> -> vector<8x8xbf16>
    %145 = vector.extract_strided_slice %140 {offsets = [0, 0], sizes = [7, 8], strides = [1, 1]} : vector<8x8xbf16> to vector<7x8xbf16>
    %146 = tpu.concatenate %141, %145 in 0 : vector<1x8xbf16>, vector<7x8xbf16> -> vector<8x8xbf16>
    %147 = vector.extract_strided_slice %140 {offsets = [1, 0], sizes = [7, 8], strides = [1, 1]} : vector<8x8xbf16> to vector<7x8xbf16>
    %148 = tpu.concatenate %147, %141 in 0 : vector<7x8xbf16>, vector<1x8xbf16> -> vector<8x8xbf16>
    %149 = vector.extract_strided_slice %140 {offsets = [2, 0], sizes = [6, 8], strides = [1, 1]} : vector<8x8xbf16> to vector<6x8xbf16>
    %150 = tpu.concatenate %149, %142 in 0 : vector<6x8xbf16>, vector<2x8xbf16> -> vector<8x8xbf16>
    %cst_74 = arith.constant 0.000000e+00 : f32
    %151 = vector.broadcast %cst_74 : f32 to vector<8x16xf32>
    %cst_75 = arith.constant dense<0.000000e+00> : vector<8x16xf32>
    %152 = tpu.matmul %144, %92, %cst_75 {dimension_numbers = #tpu.dot_dimension_numbers<[1], [0], [0], [1], [0, 0, 1, 1], [], []>} : vector<8x8xbf16>, vector<8x16xbf16>, vector<8x16xf32> -> vector<8x16xf32>
    %153 = arith.addf %151, %152 : vector<8x16xf32>
    %cst_76 = arith.constant dense<0.000000e+00> : vector<8x16xf32>
    %154 = tpu.matmul %146, %93, %cst_76 {dimension_numbers = #tpu.dot_dimension_numbers<[1], [0], [0], [1], [0, 0, 1, 1], [], []>} : vector<8x8xbf16>, vector<8x16xbf16>, vector<8x16xf32> -> vector<8x16xf32>
    %155 = arith.addf %153, %154 : vector<8x16xf32>
    %cst_77 = arith.constant dense<0.000000e+00> : vector<8x16xf32>
    %156 = tpu.matmul %140, %94, %cst_77 {dimension_numbers = #tpu.dot_dimension_numbers<[1], [0], [0], [1], [0, 0, 1, 1], [], []>} : vector<8x8xbf16>, vector<8x16xbf16>, vector<8x16xf32> -> vector<8x16xf32>
    %157 = arith.addf %155, %156 : vector<8x16xf32>
    %cst_78 = arith.constant dense<0.000000e+00> : vector<8x16xf32>
    %158 = tpu.matmul %148, %95, %cst_78 {dimension_numbers = #tpu.dot_dimension_numbers<[1], [0], [0], [1], [0, 0, 1, 1], [], []>} : vector<8x8xbf16>, vector<8x16xbf16>, vector<8x16xf32> -> vector<8x16xf32>
    %159 = arith.addf %157, %158 : vector<8x16xf32>
    %cst_79 = arith.constant dense<0.000000e+00> : vector<8x16xf32>
    %160 = tpu.matmul %150, %96, %cst_79 {dimension_numbers = #tpu.dot_dimension_numbers<[1], [0], [0], [1], [0, 0, 1, 1], [], []>} : vector<8x8xbf16>, vector<8x16xbf16>, vector<8x16xf32> -> vector<8x16xf32>
    %161 = arith.addf %159, %160 : vector<8x16xf32>
    %162 = vector.broadcast %97 : vector<1x16xf32> to vector<8x16xf32>
    %163 = arith.addf %161, %162 : vector<8x16xf32>
    %cst_80 = arith.constant 0.000000e+00 : f32
    %164 = vector.broadcast %cst_80 : f32 to vector<8x16xf32>
    %165 = arith.cmpf ogt, %163, %164 : vector<8x16xf32>
    %cst_81 = arith.constant 0.000000e+00 : f32
    %166 = vector.broadcast %cst_81 : f32 to vector<8x16xf32>
    %167 = arith.minimumf %163, %166 : vector<8x16xf32>
    %168 = math.exp %167 : vector<8x16xf32>
    %cst_82 = arith.constant 1.000000e+00 : f32
    %169 = vector.broadcast %cst_82 : f32 to vector<8x16xf32>
    %170 = arith.subf %168, %169 : vector<8x16xf32>
    %171 = arith.select %165, %163, %170 : vector<8x16xi1>, vector<8x16xf32>
    %c8 = arith.constant 8 : index
    %c0_83 = arith.constant 0 : index
    %172 = vector.load %arg5[%c8, %c0_83] : memref<16x16xf32, #tpu.memory_space<vmem>>, vector<8x16xf32>
    tpu.vector_store %arg5[%c8, %c0_83], %171 {strides = array<i32>} : memref<16x16xf32, #tpu.memory_space<vmem>>, vector<8x16xf32>,
    %c8_84 = arith.constant 8 : index
    %c0_85 = arith.constant 0 : index
    %173 = tpu.strided_load %arg5[%c8_84, %c0_85] {strides = array<i32: 2, 1>} : memref<16x16xf32, #tpu.memory_space<vmem>>, vector<4x16xf32>
    %c9 = arith.constant 9 : index
    %c0_86 = arith.constant 0 : index
    %174 = tpu.strided_load %arg5[%c9, %c0_86] {strides = array<i32: 2, 1>} : memref<16x16xf32, #tpu.memory_space<vmem>>, vector<4x16xf32>
    %175 = arith.maximumf %173, %174 : vector<4x16xf32>
    %176 = vector.broadcast %98 : vector<1x16xf32> to vector<4x16xf32>
    %177 = arith.mulf %175, %176 : vector<4x16xf32>
    %178 = vector.broadcast %99 : vector<1x16xf32> to vector<4x16xf32>
    %179 = arith.addf %177, %178 : vector<4x16xf32>
    %180 = vector.extract_strided_slice %139 {offsets = [0, 0], sizes = [1, 16], strides = [1, 1]} : vector<4x16xf32> to vector<1x16xf32>
    %181 = vector.extract_strided_slice %179 {offsets = [0, 0], sizes = [1, 16], strides = [1, 1]} : vector<4x16xf32> to vector<1x16xf32>
    %182 = vector.extract_strided_slice %139 {offsets = [1, 0], sizes = [1, 16], strides = [1, 1]} : vector<4x16xf32> to vector<1x16xf32>
    %183 = vector.extract_strided_slice %179 {offsets = [1, 0], sizes = [1, 16], strides = [1, 1]} : vector<4x16xf32> to vector<1x16xf32>
    %184 = vector.extract_strided_slice %139 {offsets = [2, 0], sizes = [1, 16], strides = [1, 1]} : vector<4x16xf32> to vector<1x16xf32>
    %185 = vector.extract_strided_slice %179 {offsets = [2, 0], sizes = [1, 16], strides = [1, 1]} : vector<4x16xf32> to vector<1x16xf32>
    %186 = vector.extract_strided_slice %139 {offsets = [3, 0], sizes = [1, 16], strides = [1, 1]} : vector<4x16xf32> to vector<1x16xf32>
    %187 = vector.extract_strided_slice %179 {offsets = [3, 0], sizes = [1, 16], strides = [1, 1]} : vector<4x16xf32> to vector<1x16xf32>
    %188 = tpu.concatenate %180, %181, %182, %183, %184, %185, %186, %187 in 0 : vector<1x16xf32>, vector<1x16xf32>, vector<1x16xf32>, vector<1x16xf32>, vector<1x16xf32>, vector<1x16xf32>, vector<1x16xf32>, vector<1x16xf32> -> vector<8x16xf32>
    %c160 = arith.constant 160 : index
    %c0_87 = arith.constant 0 : index
    %189 = vector.load %arg1[%c160, %c0_87] : memref<304x32xbf16, #tpu.memory_space<vmem>>, vector<16x32xbf16>
    %c176 = arith.constant 176 : index
    %c0_88 = arith.constant 0 : index
    %190 = vector.load %arg1[%c176, %c0_88] : memref<304x32xbf16, #tpu.memory_space<vmem>>, vector<32x32xbf16>
    %c6 = arith.constant 6 : index
    %c0_89 = arith.constant 0 : index
    %191 = vector.load %arg2[%c6, %c0_89] : memref<16x32xf32, #tpu.memory_space<vmem>>, vector<1x32xf32>
    %192 = arith.truncf %188 : vector<8x16xf32> to vector<8x16xbf16>
    %cst_90 = arith.constant dense<0.000000e+00> : vector<8x32xf32>
    %193 = tpu.matmul %192, %189, %cst_90 {dimension_numbers = #tpu.dot_dimension_numbers<[1], [0], [0], [1], [0, 0, 1, 1], [], []>} : vector<8x16xbf16>, vector<16x32xbf16>, vector<8x32xf32> -> vector<8x32xf32>
    %194 = vector.broadcast %191 : vector<1x32xf32> to vector<8x32xf32>
    %195 = arith.addf %193, %194 : vector<8x32xf32>
    %cst_91 = arith.constant 0.000000e+00 : f32
    %196 = vector.broadcast %cst_91 : f32 to vector<2x32xf32>
    %197 = vector.extract_strided_slice %195 {offsets = [0, 0], sizes = [2, 32], strides = [1, 1]} : vector<8x32xf32> to vector<2x32xf32>
    %198 = arith.truncf %196 : vector<2x32xf32> to vector<2x32xbf16>
    %cst_92 = arith.constant dense<0.000000e+00> : vector<2x32xf32>
    %199 = tpu.matmul %198, %190, %cst_92 {dimension_numbers = #tpu.dot_dimension_numbers<[1], [0], [0], [1], [0, 0, 1, 1], [], []>} : vector<2x32xbf16>, vector<32x32xbf16>, vector<2x32xf32> -> vector<2x32xf32>
    %200 = arith.addf %197, %199 : vector<2x32xf32>
    %201 = math.tanh %200 : vector<2x32xf32>
    %202 = vector.extract_strided_slice %195 {offsets = [2, 0], sizes = [2, 32], strides = [1, 1]} : vector<8x32xf32> to vector<2x32xf32>
    %203 = arith.truncf %201 : vector<2x32xf32> to vector<2x32xbf16>
    %cst_93 = arith.constant dense<0.000000e+00> : vector<2x32xf32>
    %204 = tpu.matmul %203, %190, %cst_93 {dimension_numbers = #tpu.dot_dimension_numbers<[1], [0], [0], [1], [0, 0, 1, 1], [], []>} : vector<2x32xbf16>, vector<32x32xbf16>, vector<2x32xf32> -> vector<2x32xf32>
    %205 = arith.addf %202, %204 : vector<2x32xf32>
    %206 = math.tanh %205 : vector<2x32xf32>
    %207 = vector.extract_strided_slice %195 {offsets = [4, 0], sizes = [2, 32], strides = [1, 1]} : vector<8x32xf32> to vector<2x32xf32>
    %208 = arith.truncf %206 : vector<2x32xf32> to vector<2x32xbf16>
    %cst_94 = arith.constant dense<0.000000e+00> : vector<2x32xf32>
    %209 = tpu.matmul %208, %190, %cst_94 {dimension_numbers = #tpu.dot_dimension_numbers<[1], [0], [0], [1], [0, 0, 1, 1], [], []>} : vector<2x32xbf16>, vector<32x32xbf16>, vector<2x32xf32> -> vector<2x32xf32>
    %210 = arith.addf %207, %209 : vector<2x32xf32>
    %211 = math.tanh %210 : vector<2x32xf32>
    %212 = vector.extract_strided_slice %195 {offsets = [6, 0], sizes = [2, 32], strides = [1, 1]} : vector<8x32xf32> to vector<2x32xf32>
    %213 = arith.truncf %211 : vector<2x32xf32> to vector<2x32xbf16>
    %cst_95 = arith.constant dense<0.000000e+00> : vector<2x32xf32>
    %214 = tpu.matmul %213, %190, %cst_95 {dimension_numbers = #tpu.dot_dimension_numbers<[1], [0], [0], [1], [0, 0, 1, 1], [], []>} : vector<2x32xbf16>, vector<32x32xbf16>, vector<2x32xf32> -> vector<2x32xf32>
    %215 = arith.addf %212, %214 : vector<2x32xf32>
    %216 = math.tanh %215 : vector<2x32xf32>
    %217 = tpu.concatenate %201, %206, %211, %216 in 0 : vector<2x32xf32>, vector<2x32xf32>, vector<2x32xf32>, vector<2x32xf32> -> vector<8x32xf32>
    %c208 = arith.constant 208 : index
    %c0_96 = arith.constant 0 : index
    %218 = vector.load %arg1[%c208, %c0_96] : memref<304x32xbf16, #tpu.memory_space<vmem>>, vector<32x32xbf16>
    %c240 = arith.constant 240 : index
    %c0_97 = arith.constant 0 : index
    %219 = vector.load %arg1[%c240, %c0_97] : memref<304x32xbf16, #tpu.memory_space<vmem>>, vector<32x32xbf16>
    %c7 = arith.constant 7 : index
    %c0_98 = arith.constant 0 : index
    %220 = vector.load %arg2[%c7, %c0_98] : memref<16x32xf32, #tpu.memory_space<vmem>>, vector<1x32xf32>
    %221 = arith.truncf %217 : vector<8x32xf32> to vector<8x32xbf16>
    %cst_99 = arith.constant dense<0.000000e+00> : vector<8x32xf32>
    %222 = tpu.matmul %221, %218, %cst_99 {dimension_numbers = #tpu.dot_dimension_numbers<[1], [0], [0], [1], [0, 0, 1, 1], [], []>} : vector<8x32xbf16>, vector<32x32xbf16>, vector<8x32xf32> -> vector<8x32xf32>
    %223 = vector.broadcast %220 : vector<1x32xf32> to vector<8x32xf32>
    %224 = arith.addf %222, %223 : vector<8x32xf32>
    %cst_100 = arith.constant 0.000000e+00 : f32
    %225 = vector.broadcast %cst_100 : f32 to vector<2x32xf32>
    %226 = vector.extract_strided_slice %224 {offsets = [0, 0], sizes = [2, 32], strides = [1, 1]} : vector<8x32xf32> to vector<2x32xf32>
    %227 = arith.truncf %225 : vector<2x32xf32> to vector<2x32xbf16>
    %cst_101 = arith.constant dense<0.000000e+00> : vector<2x32xf32>
    %228 = tpu.matmul %227, %219, %cst_101 {dimension_numbers = #tpu.dot_dimension_numbers<[1], [0], [0], [1], [0, 0, 1, 1], [], []>} : vector<2x32xbf16>, vector<32x32xbf16>, vector<2x32xf32> -> vector<2x32xf32>
    %229 = arith.addf %226, %228 : vector<2x32xf32>
    %230 = math.tanh %229 : vector<2x32xf32>
    %231 = vector.extract_strided_slice %224 {offsets = [2, 0], sizes = [2, 32], strides = [1, 1]} : vector<8x32xf32> to vector<2x32xf32>
    %232 = arith.truncf %230 : vector<2x32xf32> to vector<2x32xbf16>
    %cst_102 = arith.constant dense<0.000000e+00> : vector<2x32xf32>
    %233 = tpu.matmul %232, %219, %cst_102 {dimension_numbers = #tpu.dot_dimension_numbers<[1], [0], [0], [1], [0, 0, 1, 1], [], []>} : vector<2x32xbf16>, vector<32x32xbf16>, vector<2x32xf32> -> vector<2x32xf32>
    %234 = arith.addf %231, %233 : vector<2x32xf32>
    %235 = math.tanh %234 : vector<2x32xf32>
    %236 = vector.extract_strided_slice %224 {offsets = [4, 0], sizes = [2, 32], strides = [1, 1]} : vector<8x32xf32> to vector<2x32xf32>
    %237 = arith.truncf %235 : vector<2x32xf32> to vector<2x32xbf16>
    %cst_103 = arith.constant dense<0.000000e+00> : vector<2x32xf32>
    %238 = tpu.matmul %237, %219, %cst_103 {dimension_numbers = #tpu.dot_dimension_numbers<[1], [0], [0], [1], [0, 0, 1, 1], [], []>} : vector<2x32xbf16>, vector<32x32xbf16>, vector<2x32xf32> -> vector<2x32xf32>
    %239 = arith.addf %236, %238 : vector<2x32xf32>
    %240 = math.tanh %239 : vector<2x32xf32>
    %241 = vector.extract_strided_slice %224 {offsets = [6, 0], sizes = [2, 32], strides = [1, 1]} : vector<8x32xf32> to vector<2x32xf32>
    %242 = arith.truncf %240 : vector<2x32xf32> to vector<2x32xbf16>
    %cst_104 = arith.constant dense<0.000000e+00> : vector<2x32xf32>
    %243 = tpu.matmul %242, %219, %cst_104 {dimension_numbers = #tpu.dot_dimension_numbers<[1], [0], [0], [1], [0, 0, 1, 1], [], []>} : vector<2x32xbf16>, vector<32x32xbf16>, vector<2x32xf32> -> vector<2x32xf32>
    %244 = arith.addf %241, %243 : vector<2x32xf32>
    %245 = math.tanh %244 : vector<2x32xf32>
    %c272 = arith.constant 272 : index
    %c0_105 = arith.constant 0 : index
    %246 = vector.load %arg1[%c272, %c0_105] : memref<304x32xbf16, #tpu.memory_space<vmem>>, vector<32x4xbf16>
    %c8_106 = arith.constant 8 : index
    %c0_107 = arith.constant 0 : index
    %247 = vector.load %arg2[%c8_106, %c0_107] : memref<16x32xf32, #tpu.memory_space<vmem>>, vector<1x4xf32>
    %cst_108 = arith.constant 0.000000e+00 : f32
    %248 = vector.broadcast %cst_108 : f32 to vector<2x32xf32>
    %249 = arith.maximumf %245, %248 : vector<2x32xf32>
    %250 = arith.truncf %249 : vector<2x32xf32> to vector<2x32xbf16>
    %cst_109 = arith.constant dense<0.000000e+00> : vector<2x4xf32>
    %251 = tpu.matmul %250, %246, %cst_109 {dimension_numbers = #tpu.dot_dimension_numbers<[1], [0], [0], [1], [0, 0, 1, 1], [], []>} : vector<2x32xbf16>, vector<32x4xbf16>, vector<2x4xf32> -> vector<2x4xf32>
    %252 = vector.broadcast %247 : vector<1x4xf32> to vector<2x4xf32>
    %253 = arith.addf %251, %252 : vector<2x4xf32>
    %c0_110 = arith.constant 0 : index
    %c0_111 = arith.constant 0 : index
    %254 = vector.load %arg3[%c0_110, %c0_111] : memref<2x4xf32, #tpu.memory_space<vmem>>, vector<2x4xf32>
    tpu.vector_store %arg3[%c0_110, %c0_111], %253 {strides = array<i32>} : memref<2x4xf32, #tpu.memory_space<vmem>>, vector<2x4xf32>,
    return
  }
}

</mosaic_0001>

<bundles_post_ra>
// kernel: forward.1
= control target key start
LH: loop header
LB: loop body
LE: loop exit
PB: predicated region body
PF: predicated region fallthrough
CT: control target
= control target key end

     0   :  { %vm63_vm0 = vcmask 1041408   ;;  %v2196_v2 = vmov 0.0   ;;  %vm32_vm1 = vcmask 1040384   ;;  %vm2197_vm2 = vmmov 0   ;;  %s2556_s0 = inlined_call_operand.vmem [shape: f32[2,16,4], index: 0, kind: input, shape index: {}]   ;;  %s2557_s1 = inlined_call_operand.vmem [shape: bf16[304,32], index: 1, kind: input, shape index: {}]   ;;  %s2558_s2 = inlined_call_operand.vmem [shape: f32[16,32], index: 2, kind: input, shape index: {}]   ;;  %s2559_s3 = inlined_call_operand.hbm [shape: f32[2,4], index: 3, kind: output, shape index: {}]  }
   0x1   :  { %v22_v0 = vld [vmem:[%s2557_s1 + $0x8] sm:$0x3]  ;;  %v21_v1 = vld [vmem:[%s2557_s1] sm:$0x3]  ;;  %1925 = vmatprep.subr.bf16.mxu0 %v2196_v2  ;;  %1931 = vmatprep.subr.bf16.mxu1 %v2196_v2  ;;  %vm59_vm3 = vcmask 31744   ;;  %v1798_v9 = vld [vmem:[%s2556_s0 + $0x10] sm:$0xff] }
   0x2   :  { %v65_v3 = vsel %vm63_vm0, %v22_v0, 0  ;;  %v2230_v4 = vsel %vm63_vm0, %v21_v1, 0  ;;  %v16_v5 = vld [vmem:[%s2556_s0] sm:$0xff]  ;;  %v17_v6 = vld [vmem:[%s2556_s0 + $0x8] sm:$0xff]  ;;  %1933 = vmatprep.mubr.msk.bf16.mxu1 %vm2197_vm2, %v2196_v2  ;;  %1927 = vmatprep.mubr.msk.bf16.mxu0 %vm2197_vm2, %v2196_v2  ;;  %vm45_vm4 = vsmask.f32 256 }
   0x3   :  { %1926 = vmatpush3.bf16.msra.mxu0 %v65_v3  ;;  %1932 = vmatpush3.bf16.msra.mxu1 %v2230_v4  ;;  %v29_v7 = vpack.c.bf16 %v17_v6, %v16_v5  ;;  %v24_v8 = vld [vmem:[%s2557_s1 + $0x18] sm:$0x3]  ;;  %v23_v13 = vld [vmem:[%s2557_s1 + $0x10] sm:$0x3]  ;;  %vm51_vm5 = vcmask 1047552   ;;  %vm2262_vm7 = vmand %vm32_vm1, %vm45_vm4 }
   0x4   :  { %1937 = vmatprep.subr.bf16.mxu0 %v2196_v2  ;;  %1943 = vmatprep.subr.bf16.mxu1 %v2196_v2  ;;  %v206_v14 = vsel %vm63_vm0, %v24_v8, 0  ;;  %vm52_vm6 = vsmask.f32 7424  ;;  %v1799_v15 = vld [vmem:[%s2556_s0 + $0x18] sm:$0xff]  ;;  %v157_v25 = vsel %vm63_vm0, %v23_v13, 0 }
   0x5   :  { %v31_v10 = vrot.slane %v29_v7, 7  ;;  %v37_v11 = vshrl.u32 %v29_v7, 16  ;;  %v40_v12 = vshll.u32 %v29_v7, 16  ;;  %v334_v19 = vpack.c.bf16 %v1799_v15, %v1798_v9  ;;  %vm2268_vm8 = vmand %vm51_vm5, %vm52_vm6  ;;  %v25_v30 = vld [vmem:[%s2557_s1 + $0x20] sm:$0x3] }
   0x7   :  { %v35_v16 = vsel %vm32_vm1, 0, %v31_v10  ;;  %v39_v17 = vrot.slane %v37_v11, 7  ;;  %v48_v18 = vrot.slane %v40_v12, 1  ;;  %v340_v24 = vshrl.u32 %v334_v19, 16 }
   0x8   :  { %1934 = vmatmul.mubr.msk.bf16.vlgmr.msra.gmra.mrb[0].mxu1 %vm59_vm3, %v35_v16  ;;  %v343_v27 = vshll.u32 %v334_v19, 16 }
   0x9   :  { %v42_v21 = vor.u32 %v40_v12, %v39_v17  ;;  %1944 = vmatpush3.bf16.msra.mxu1 %v206_v14  ;;  %1945 = vmatprep.mubr.msk.bf16.mxu1 %vm2197_vm2, %v2196_v2  ;;  %v49_v22 = vor.u32 %v48_v18, %v37_v11  ;;  %v342_v29 = vrot.slane %v340_v24, 7 }
   0xa   :  { %1955 = vmatprep.subr.bf16.mxu1 %v2196_v2 }
   0xb   :  { %v47_v26 = vsel %vm2262_vm7, 0, %v42_v21  ;;  %v54_v28 = vsel %vm2268_vm8, %v49_v22, 0 }
   0xc   :  { %1928 = vmatmul.mubr.msk.bf16.vlgmr.msra.gmra.mrb[0].mxu0 %vm59_vm3, %v47_v26 }
   0xd   :  { %1938 = vmatpush3.bf16.msra.mxu0 %v157_v25  ;;  %1939 = vmatprep.mubr.msk.bf16.mxu0 %vm2197_vm2, %v2196_v2 }
   0xe   :  { %1949 = vmatprep.subr.bf16.mxu0 %v2196_v2 }
   0xf   :  { %8 = vsyncpa [#allocation5], 0  ;;  %v345_v31 = vor.u32 %v343_v27, %v342_v29  ;;  %v254_v32 = vsel %vm63_vm0, %v25_v30, 0  ;;  %v55_v34 = vrot.slane %v29_v7, 1  ;;  %vm56_vm9 = vcmask 1046528   ;;  %s2199_s20 = smov [#allocation4]  }
  0x10   :  { %1946 = vmatmul.mubr.msk.bf16.vlgmr.msra.gmra.mrb[4].mxu1 %vm59_vm3, %v54_v28  ;;  %v336_v36 = vrot.slane %v334_v19, 7  ;;  %v352_v38 = vrot.slane %v334_v19, 1  ;;  %v348_v39 = vrot.slane %v343_v27, 1  ;;  %vm626_vm10 = vcmask 1043456   ;;  %v601_v43 = vld [vmem:[%s2557_s1 + $0x28] sm:$0xf] }
  0x11   :  { %1956 = vmatpush3.bf16.msra.mxu1 %v65_v3  ;;  %1957 = vmatprep.mubr.msk.bf16.mxu1 %vm2197_vm2, %v2196_v2  ;;  %v347_v33 = vsel %vm2262_vm7, 0, %v345_v31  ;;  %v58_v35 = vsel %vm56_vm9, %v55_v34, 0  ;;  %v2328_v44 = vsel %vm626_vm10, %v601_v43, 0  ;;  %v602_v45 = vld [vmem:[%s2557_s1 + $0x30] sm:$0xf]  ;;  %vm317_vm11 = vcmask 64512  }
  0x12   :  { %1967 = vmatprep.subr.bf16.mxu1 %v2196_v2  ;;  %v338_v37 = vsel %vm32_vm1, 0, %v336_v36  ;;  %v354_v40 = vsel %vm56_vm9, %v352_v38, 0  ;;  %v349_v41 = vor.u32 %v348_v39, %v340_v24  ;;  %v2336_v46 = vsel %vm626_vm10, %v602_v45, 0  ;;  %v1805_v10 = vld [vmem:[%s2558_s2] ss:$0 sm:$0xff] }
  0x13   :  { %vm631_vm5 = vcmask 1042432   ;;  %vm876_vm6 = vcmask 130048  }
  0x14   :  { %1940 = vmatmul.mubr.msk.bf16.vlgmr.msra.gmra.mrb[4].mxu0 %vm59_vm3, %v29_v7  ;;  %v351_v42 = vsel %vm2268_vm8, %v349_v41, 0 }
  0x15   :  { %1950 = vmatpush3.bf16.msra.mxu0 %v254_v32  ;;  %1951 = vmatprep.mubr.msk.bf16.mxu0 %vm2197_vm2, %v2196_v2 }
  0x16   :  { %1961 = vmatprep.subr.bf16.mxu0 %v2196_v2 }
  0x18   :  { %1958 = vmatmul.mubr.msk.bf16.vlgmr.msra.gmra.mrb[8].mxu1 %vm59_vm3, %v347_v33 }
  0x19   :  { %1968 = vmatpush3.bf16.msra.mxu1 %v157_v25  ;;  %1969 = vmatprep.mubr.msk.bf16.mxu1 %vm2197_vm2, %v2196_v2 }
  0x1a   :  { %1979 = vmatprep.subr.bf16.mxu1 %v2196_v2 }
  0x1c   :  { %1952 = vmatmul.mubr.msk.bf16.vlgmr.msra.gmra.mrb[8].mxu0 %vm59_vm3, %v58_v35 }
  0x1d   :  { %1962 = vmatpush3.bf16.msra.mxu0 %v2230_v4  ;;  %1963 = vmatprep.mubr.msk.bf16.mxu0 %vm2197_vm2, %v2196_v2 }
  0x1e   :  { %1973 = vmatprep.subr.bf16.mxu0 %v2196_v2 }
  0x20   :  { %1970 = vmatmul.mubr.msk.bf16.vlgmr.msra.gmra.mrb[12].mxu1 %vm59_vm3, %v334_v19 }
  0x21   :  { %1980 = vmatpush3.bf16.msra.mxu1 %v254_v32  ;;  %1981 = vmatprep.mubr.msk.bf16.mxu1 %vm2197_vm2, %v2196_v2 }
  0x22   :  { %1991 = vmatprep.subr.bf16.mxu1 %v2196_v2 }
  0x24   :  { %1964 = vmatmul.mubr.msk.bf16.vlgmr.msra.gmra.mrb[12].mxu0 %vm59_vm3, %v338_v37 }
  0x25   :  { %1974 = vmatpush3.bf16.msra.mxu0 %v206_v14  ;;  %1975 = vmatprep.mubr.msk.bf16.mxu0 %vm2197_vm2, %v2196_v2 }
  0x26   :  { %1985 = vmatprep.subr.bf16.mxu0 %v2196_v2 }
  0x28   :  { %1982 = vmatmul.mubr.msk.bf16.vlgmr.msra.gmra.mrb[16].mxu1 %vm59_vm3, %v354_v40 }
  0x29   :  { %1993 = vmatprep.mubr.msk.bf16.mxu1 %vm2197_vm2, %v2196_v2  ;;  %1992 = vmatpush3.bf16.msra.mxu1 %v2328_v44 }
  0x2a   :  { %2003 = vmatprep.subr.bf16.mxu1 %v2196_v2 }
  0x2c   :  { %1976 = vmatmul.mubr.msk.bf16.vlgmr.msra.gmra.mrb[16].mxu0 %vm59_vm3, %v351_v42  ;;  %vm627_vm3 = vsmask.f32 3328 }
  0x2d   :  { %1987 = vmatprep.mubr.msk.bf16.mxu0 %vm2197_vm2, %v2196_v2  ;;  %1986 = vmatpush3.bf16.msra.mxu0 %v2336_v46  ;;  %vm2370_vm4 = vmand %vm626_vm10, %vm627_vm3 }
  0x2e   :  { %1997 = vmatprep.subr.bf16.mxu0 %v2196_v2 }
  0xdb   :  { %v147_v47 = vpop.f32.mrb[0].mxu1 }
  0xdc   :  { %v1935_v48 = vpop.f32.mrb[1].mxu1 }
  0xdd   :  { %v150_v49 = vpop.f32.mrb[2].mxu1 }
  0xde   :  { %v1936_v50 = vpop.f32.mrb[3].mxu1 }
  0xdf   :  { %v101_v51 = vpop.f32.mrb[0].mxu0 }
  0xe0   :  { %v148_v52 = vadd.f32 %v147_v47, %v101_v51  ;;  %v1929_v53 = vpop.f32.mrb[1].mxu0 }
  0xe1   :  { %v104_v54 = vpop.f32.mrb[2].mxu0 }
  0xe2   :  { %v151_v55 = vadd.f32 %v150_v49, %v104_v54  ;;  %v1930_v56 = vpop.f32.mrb[3].mxu0 }
  0xe3   :  { %v242_v57 = vpop.f32.mrb[4].mxu1 }
  0xe4   :  { %v1947_v58 = vpop.f32.mrb[5].mxu1 }
  0xe5   :  { %v245_v59 = vpop.f32.mrb[6].mxu1 }
  0xe6   :  { %v1948_v60 = vpop.f32.mrb[7].mxu1 }
  0xe7   :  { %v193_v61 = vpop.f32.mrb[4].mxu0 }
  0xe8   :  { %v200_v62 = vadd.f32 %v193_v61, %v148_v52  ;;  %v1941_v63 = vpop.f32.mrb[5].mxu0 }
  0xe9   :  { %v196_v0 = vpop.f32.mrb[6].mxu0 }
  0xea   :  { %v201_v1 = vadd.f32 %v196_v0, %v151_v55  ;;  %v1942_v3 = vpop.f32.mrb[7].mxu0  ;;  %v249_v4 = vadd.f32 %v242_v57, %v200_v62  ;;  %v1808_v62 = vld [vmem:[%s2558_s2 + $0x1] ss:$0 sm:$0xff] }
  0xeb   :  { %v392_v5 = vpop.f32.mrb[8].mxu1  ;;  %v1809_v3 = vld [vmem:[%s2558_s2 + $0x2] ss:$0 sm:$0xff] }
  0xec   :  { %v1959_v6 = vpop.f32.mrb[9].mxu1  ;;  %v250_v7 = vadd.f32 %v245_v59, %v201_v1 }
  0xed   :  { %v395_v8 = vpop.f32.mrb[10].mxu1 }
  0xee   :  { %v1960_v9 = vpop.f32.mrb[11].mxu1 }
  0xef   :  { %v290_v11 = vpop.f32.mrb[8].mxu0 }
  0xf0   :  { %v297_v12 = vadd.f32 %v290_v11, %v249_v4  ;;  %v1953_v13 = vpop.f32.mrb[9].mxu0 }
  0xf1   :  { %v293_v14 = vpop.f32.mrb[10].mxu0 }
  0xf2   :  { %v303_v15 = vadd.f32 %v1805_v10, %v297_v12  ;;  %v298_v16 = vadd.f32 %v293_v14, %v250_v7  ;;  %v1954_v17 = vpop.f32.mrb[11].mxu0 }
  0xf3   :  { %v478_v18 = vpop.f32.mrb[12].mxu1 }
  0xf4   :  { %v307_v19 = vmin.f32 %v303_v15, 0.0  ;;  %v304_v21 = vadd.f32 %v1805_v10, %v298_v16  ;;  %v1971_v22 = vpop.f32.mrb[13].mxu1  ;;  %vm305_vm12 = vcmp.gt.f32.partialorder %v303_v15, 0.0 }
  0xf5   :  { %v481_v23 = vpop.f32.mrb[14].mxu1 }
  0xf6   :  { %v309_v24 = vmul.f32 1.442695, %v307_v19  ;;  %v308_v25 = vmin.f32 %v304_v21, 0.0  ;;  %v1972_v26 = vpop.f32.mrb[15].mxu1  ;;  %vm306_vm13 = vcmp.gt.f32.partialorder %v304_v21, 0.0 }
  0xf7   :  { %v435_v27 = vpop.f32.mrb[12].mxu0 }
  0xf8   :  { %2144 = vpow2.f32 %v309_v24  ;;  %v311_v28 = vmul.f32 1.442695, %v308_v25  ;;  %v436_v29 = vadd.f32 %v435_v27, %v392_v5  ;;  %v1965_v30 = vpop.f32.mrb[13].mxu0 }
  0xf9   :  { %v438_v31 = vpop.f32.mrb[14].mxu0 }
  0xfa   :  { %2146 = vpow2.f32 %v311_v28  ;;  %v439_v32 = vadd.f32 %v438_v31, %v395_v8  ;;  %v1966_v33 = vpop.f32.mrb[15].mxu0  ;;  %v485_v34 = vadd.f32 %v478_v18, %v436_v29  ;;  %v605_v31 = vld [vmem:[%s2557_s1 + $0x48] sm:$0xf] }
  0xfb   :  { %v569_v35 = vpop.f32.mrb[16].mxu1 }
  0xfc   :  { %v1983_v36 = vpop.f32.mrb[17].mxu1  ;;  %v486_v37 = vadd.f32 %v481_v23, %v439_v32 }
  0xfd   :  { %v572_v38 = vpop.f32.mrb[18].mxu1 }
  0xfe   :  { %v1984_v39 = vpop.f32.mrb[19].mxu1 }
  0xff   :  { %v524_v40 = vpop.f32.mrb[16].mxu0 }
 0x100   :  { %v531_v41 = vadd.f32 %v524_v40, %v485_v34  ;;  %v1977_v42 = vpop.f32.mrb[17].mxu0  ;;  %v822_v34 = vsel %vm626_vm10, %v605_v31, 0 }
 0x101   :  { %v527_v43 = vpop.f32.mrb[18].mxu0 }
 0x102   :  { %v2145_v45 = vpop.eup %2144  ;;  %v576_v47 = vadd.f32 %v569_v35, %v531_v41  ;;  %v532_v48 = vadd.f32 %v527_v43, %v486_v37  ;;  %v1978_v49 = vpop.f32.mrb[19].mxu0 }
 0x103   :  { %v1806_v50 = vadd.f32 -1.0, %v2145_v45 }
 0x104   :  { %v2147_v51 = vpop.eup %2146  ;;  %v578_v52 = vadd.f32 %v1805_v10, %v576_v47  ;;  %v577_v53 = vadd.f32 %v572_v38, %v532_v48 }
 0x105   :  { %v315_v54 = vsel %vm305_vm12, %v303_v15, %v1806_v50  ;;  %v1807_v55 = vadd.f32 -1.0, %v2147_v51  ;;  %v2135_v50 = vld [vmem:[%s2557_s1 + $0x50] sm:$0xff]   ;;  %v2428_v51 = vld [vmem:[%s2557_s1 + $0x58] sm:$0xff]   ;;  %vm1165_vm12 = vcmask 1045504  }
 0x106   :  { %318 = vst.msk [vmem:[#allocation2] sm:$0xff] %vm317_vm11, %v315_v54  ;;  %v582_v56 = vmin.f32 %v578_v52, 0.0  ;;  %v579_v57 = vadd.f32 %v1805_v10, %v577_v53  ;;  %vm580_vm14 = vcmp.gt.f32.partialorder %v578_v52, 0.0  ;;  %v604_v10 = vld [vmem:[%s2557_s1 + $0x40] sm:$0xf]  ;;  %v2198_v53 = vmov 0  }
 0x107   :  { %v316_v58 = vsel %vm306_vm13, %v304_v21, %v1807_v55  ;;  %v776_v17 = vsel %vm626_vm10, %v604_v10, 0  ;;  %v603_v21 = vld [vmem:[%s2557_s1 + $0x38] sm:$0xf]  ;;  %v1822_v10 = vld [vmem:[%s2558_s2 + $0x3] ss:$0 sm:$0xff] }
 0x108   :  { %319 = vst.msk [vmem:[#allocation2 + $0x8] sm:$0xff] %vm317_vm11, %v316_v58  ;;  %v584_v59 = vmul.f32 1.442695, %v582_v56  ;;  %v583_v60 = vmin.f32 %v579_v57, 0.0  ;;  %vm581_vm15 = vcmp.gt.f32.partialorder %v579_v57, 0.0  ;;  %v729_v24 = vsel %vm626_vm10, %v603_v21, 0 }
 0x10a   :  { %2148 = vpow2.f32 %v584_v59  ;;  %v586_v61 = vmul.f32 1.442695, %v583_v60 }
 0x10c   :  { %2150 = vpow2.f32 %v586_v61 }
 0x10f   :  { %v320_v63 = vld [vmem:[#allocation2] ss:$2 sm:$0xff]  ;;  %v322_v0 = vld [vmem:[#allocation2 + $0x1] ss:$2 sm:$0xff] }
 0x110   :  { %v323_v1 = vmax.f32 %v320_v63, %v322_v0 }
 0x112   :  { %v328_v4 = vmul.f32 %v1808_v62, %v323_v1 }
 0x114   :  { %v2149_v5 = vpop.eup %2148  ;;  %v333_v6 = vadd.f32 %v1809_v3, %v328_v4 }
 0x115   :  { %v1815_v7 = vadd.f32 -1.0, %v2149_v5 }
 0x116   :  { %v2151_v8 = vpop.eup %2150  ;;  %v609_v9 = vpack.c.bf16 %v333_v6, %v333_v6 }
 0x117   :  { %v590_v11 = vsel %vm580_vm14, %v578_v52, %v1815_v7  ;;  %v1816_v12 = vadd.f32 -1.0, %v2151_v8  ;;  %v2434_v52 = vld [vmem:[%s2557_s1 + $0x60] sm:$0xff]  }
 0x118   :  { %592 = vst.msk [vmem:[#allocation2 + $0x10] sm:$0xff] %vm317_vm11, %v590_v11  ;;  %v611_v13 = vrot.slane %v609_v9, 7  ;;  %v615_v14 = vshrl.u32 %v609_v9, 16  ;;  %v618_v15 = vshll.u32 %v609_v9, 16  ;;  %v630_v37 = vrot.slane %v609_v9, 1 }
 0x119   :  { %v591_v16 = vsel %vm581_vm15, %v579_v57, %v1816_v12 }
 0x11a   :  { %593 = vst.msk [vmem:[#allocation2 + $0x18] sm:$0xff] %vm317_vm11, %v591_v16  ;;  %v613_v18 = vsel %vm32_vm1, 0, %v611_v13  ;;  %v617_v19 = vrot.slane %v615_v14, 7  ;;  %v623_v22 = vrot.slane %v618_v15, 1  ;;  %v633_v40 = vsel %vm631_vm5, %v630_v37, 0 }
 0x11b   :  { %1994 = vmatmul.mubr.msk.bf16.vlgmr.msra.gmra.mrb[20].mxu1 %vm317_vm11, %v613_v18 }
 0x11c   :  { %v620_v23 = vor.u32 %v618_v15, %v617_v19  ;;  %2004 = vmatpush3.bf16.msra.mxu1 %v776_v17  ;;  %2005 = vmatprep.mubr.msk.bf16.mxu1 %vm2197_vm2, %v2196_v2  ;;  %v624_v26 = vor.u32 %v623_v22, %v615_v14 }
 0x11d   :  { %2015 = vmatprep.subr.bf16.mxu1 %v2196_v2 }
 0x11e   :  { %v622_v25 = vsel %vm2262_vm7, 0, %v620_v23  ;;  %v629_v30 = vsel %vm2370_vm4, %v624_v26, 0 }
 0x11f   :  { %1988 = vmatmul.mubr.msk.bf16.vlgmr.msra.gmra.mrb[20].mxu0 %vm317_vm11, %v622_v25 }
 0x120   :  { %1998 = vmatpush3.bf16.msra.mxu0 %v729_v24  ;;  %1999 = vmatprep.mubr.msk.bf16.mxu0 %vm2197_vm2, %v2196_v2 }
 0x121   :  { %2009 = vmatprep.subr.bf16.mxu0 %v2196_v2  ;;  %v595_v28 = vld [vmem:[#allocation2 + $0x10] ss:$2 sm:$0xff]  ;;  %v597_v29 = vld [vmem:[#allocation2 + $0x11] ss:$2 sm:$0xff] }
 0x122   :  { %v598_v32 = vmax.f32 %v595_v28, %v597_v29 }
 0x123   :  { %2006 = vmatmul.mubr.msk.bf16.vlgmr.msra.gmra.mrb[24].mxu1 %vm317_vm11, %v629_v30 }
 0x124   :  { %2016 = vmatpush3.bf16.msra.mxu1 %v2336_v46  ;;  %2017 = vmatprep.mubr.msk.bf16.mxu1 %vm2197_vm2, %v2196_v2  ;;  %v599_v33 = vmul.f32 %v1808_v62, %v598_v32 }
 0x125   :  { %2027 = vmatprep.subr.bf16.mxu1 %v2196_v2 }
 0x126   :  { %v600_v35 = vadd.f32 %v1809_v3, %v599_v33 }
 0x127   :  { %2000 = vmatmul.mubr.msk.bf16.vlgmr.msra.gmra.mrb[24].mxu0 %vm317_vm11, %v609_v9 }
 0x128   :  { %2010 = vmatpush3.bf16.msra.mxu0 %v822_v34  ;;  %2011 = vmatprep.mubr.msk.bf16.mxu0 %vm2197_vm2, %v2196_v2  ;;  %v892_v36 = vpack.c.bf16 %v600_v35, %v600_v35 }
 0x129   :  { %2021 = vmatprep.subr.bf16.mxu0 %v2196_v2 }
 0x12a   :  { %v898_v46 = vshrl.u32 %v892_v36, 16  ;;  %v901_v39 = vshll.u32 %v892_v36, 16  ;;  %v894_v43 = vrot.slane %v892_v36, 7  ;;  %v910_v47 = vrot.slane %v892_v36, 1 }
 0x12c   :  { %v900_v38 = vrot.slane %v898_v46, 7  ;;  %v896_v45 = vsel %vm32_vm1, 0, %v894_v43  ;;  %v912_v49 = vsel %vm631_vm5, %v910_v47, 0 }
 0x12e   :  { %v903_v41 = vor.u32 %v901_v39, %v900_v38 }
 0x12f   :  { %2012 = vmatmul.mubr.msk.bf16.vlgmr.msra.gmra.mrb[28].mxu0 %vm317_vm11, %v633_v40 }
 0x130   :  { %2022 = vmatpush3.bf16.msra.mxu0 %v2328_v44  ;;  %v905_v42 = vsel %vm2262_vm7, 0, %v903_v41  ;;  %2023 = vmatprep.mubr.msk.bf16.mxu0 %vm2197_vm2, %v2196_v2  ;;  %v906_v44 = vrot.slane %v901_v39, 1 }
 0x131   :  { %2018 = vmatmul.mubr.msk.bf16.vlgmr.msra.gmra.mrb[28].mxu1 %vm317_vm11, %v905_v42  ;;  %2033 = vmatprep.subr.bf16.mxu0 %v2196_v2 }
 0x132   :  { %2028 = vmatpush3.bf16.msra.mxu1 %v729_v24  ;;  %2029 = vmatprep.mubr.msk.bf16.mxu1 %vm2197_vm2, %v2196_v2  ;;  %v907_v20 = vor.u32 %v906_v44, %v898_v46 }
 0x133   :  { %2039 = vmatprep.subr.bf16.mxu1 %v2196_v2 }
 0x134   :  { %v909_v48 = vsel %vm2370_vm4, %v907_v20, 0 }
 0x137   :  { %2024 = vmatmul.mubr.msk.bf16.vlgmr.msra.gmra.mrb[32].mxu0 %vm317_vm11, %v896_v45 }
 0x138   :  { %2034 = vmatpush3.bf16.msra.mxu0 %v776_v17  ;;  %2035 = vmatprep.mubr.msk.bf16.mxu0 %vm2197_vm2, %v2196_v2 }
 0x139   :  { %2030 = vmatmul.mubr.msk.bf16.vlgmr.msra.gmra.mrb[32].mxu1 %vm317_vm11, %v892_v36  ;;  %2045 = vmatprep.subr.bf16.mxu0 %v2196_v2 }
 0x13a   :  { %2040 = vmatpush3.bf16.msra.mxu1 %v822_v34  ;;  %2041 = vmatprep.mubr.msk.bf16.mxu1 %vm2197_vm2, %v2196_v2 }
 0x13b   :  { %2051 = vmatprep.subr.bf16.mxu1 %v2196_v2 }
 0x13f   :  { %2036 = vmatmul.mubr.msk.bf16.vlgmr.msra.gmra.mrb[36].mxu0 %vm317_vm11, %v909_v48 }
 0x140   :  { %2047 = vmatprep.mubr.msk.bf16.mxu0 %vm2197_vm2, %v2196_v2  ;;  %2046 = vmatpush3.bf16.msra.mxu0 %v2135_v50 }
 0x141   :  { %2042 = vmatmul.mubr.msk.bf16.vlgmr.msra.gmra.mrb[36].mxu1 %vm317_vm11, %v912_v49  ;;  %2059 = vmatprep.subr.bf16.mxu0 %v2196_v2  ;;  %vm1163_vm11 = vcmask 1044480  }
 0x142   :  { %2055 = vmatprep.mubr.msk.bf16.mxu1 %vm2197_vm2, %v2196_v2  ;;  %2052 = vmatpush3.bf16.msra.mxu1 %v2428_v51 }
 0x143   :  { %2053 = vmatprep.subr.bf16.mxu1 %v2196_v2 }
 0x146   :  { %2054 = vmatpush3.bf16.msra.mxu1 %v2434_v52 }
 0x147   :  { %2067 = vmatprep.subr.bf16.mxu1 %v2196_v2 }
 0x149   :  { %2056 = vmatmul.mubr.bf16.vlgmr.msra.gmra.mrb[40].mxu1 %v2198_v53 }
 0x14a   :  { %2068 = vmatpush3.bf16.msra.mxu1 %v2428_v51  ;;  %2071 = vmatprep.mubr.msk.bf16.mxu1 %vm2197_vm2, %v2196_v2 }
 0x14b   :  { %2069 = vmatprep.subr.bf16.mxu1 %v2196_v2 }
 0x14e   :  { %2070 = vmatpush3.bf16.msra.mxu1 %v2434_v52 }
 0x14f   :  { %2083 = vmatprep.subr.bf16.mxu1 %v2196_v2 }
 0x1ee   :  { %v720_v54 = vpop.f32.mrb[20].mxu1 }
 0x1ef   :  { %v1995_v55 = vpop.f32.mrb[21].mxu1 }
 0x1f0   :  { %v723_v56 = vpop.f32.mrb[22].mxu1 }
 0x1f1   :  { %v1996_v57 = vpop.f32.mrb[23].mxu1 }
 0x1f2   :  { %v675_v58 = vpop.f32.mrb[20].mxu0 }
 0x1f3   :  { %v721_v59 = vadd.f32 %v720_v54, %v675_v58  ;;  %v1989_v60 = vpop.f32.mrb[21].mxu0  ;;  %v1824_v58 = vld [vmem:[%s2558_s2 + $0x4] ss:$0 sm:$0xff] }
 0x1f4   :  { %v678_v61 = vpop.f32.mrb[22].mxu0 }
 0x1f5   :  { %v1990_v62 = vpop.f32.mrb[23].mxu0 }
 0x1f6   :  { %v812_v63 = vpop.f32.mrb[24].mxu1  ;;  %v1825_v62 = vld [vmem:[%s2558_s2 + $0x5] ss:$0 sm:$0xff] }
 0x1f7   :  { %v2007_v0 = vpop.f32.mrb[25].mxu1 }
 0x1f8   :  { %v815_v1 = vpop.f32.mrb[26].mxu1 }
 0x1f9   :  { %v2008_v3 = vpop.f32.mrb[27].mxu1 }
 0x1fa   :  { %v765_v4 = vpop.f32.mrb[24].mxu0 }
 0x1fb   :  { %v771_v5 = vadd.f32 %v765_v4, %v721_v59  ;;  %v2001_v6 = vpop.f32.mrb[25].mxu0 }
 0x1fc   :  { %v768_v7 = vpop.f32.mrb[26].mxu0 }
 0x1fd   :  { %v2002_v8 = vpop.f32.mrb[27].mxu0  ;;  %v818_v9 = vadd.f32 %v812_v63, %v771_v5 }
 0x202   :  { %v858_v11 = vpop.f32.mrb[28].mxu0 }
 0x203   :  { %v864_v12 = vadd.f32 %v858_v11, %v818_v9  ;;  %v2013_v13 = vpop.f32.mrb[29].mxu0 }
 0x204   :  { %v861_v14 = vpop.f32.mrb[30].mxu0  ;;  %v950_v15 = vpop.f32.mrb[28].mxu1 }
 0x205   :  { %v869_v16 = vadd.f32 %v1822_v10, %v864_v12  ;;  %v2014_v17 = vpop.f32.mrb[31].mxu0  ;;  %v2019_v18 = vpop.f32.mrb[29].mxu1 }
 0x206   :  { %v953_v19 = vpop.f32.mrb[30].mxu1 }
 0x207   :  { %v871_v21 = vmin.f32 %v869_v16, 0.0  ;;  %v2020_v22 = vpop.f32.mrb[31].mxu1  ;;  %vm870_vm7 = vcmp.gt.f32.partialorder %v869_v16, 0.0 }
 0x209   :  { %v872_v23 = vmul.f32 1.442695, %v871_v21 }
 0x20a   :  { %v992_v24 = vpop.f32.mrb[32].mxu0 }
 0x20b   :  { %2152 = vpow2.f32 %v872_v23  ;;  %v993_v25 = vadd.f32 %v992_v24, %v950_v15  ;;  %v2025_v26 = vpop.f32.mrb[33].mxu0  ;;  %v1832_v24 = vld [vmem:[%s2558_s2 + $0x6] ss:$0 sm:$0xff] }
 0x20c   :  { %v995_v27 = vpop.f32.mrb[34].mxu0  ;;  %v1034_v28 = vpop.f32.mrb[32].mxu1 }
 0x20d   :  { %v1040_v29 = vadd.f32 %v1034_v28, %v993_v25  ;;  %v2026_v30 = vpop.f32.mrb[35].mxu0  ;;  %v2031_v31 = vpop.f32.mrb[33].mxu1 }
 0x20e   :  { %v1037_v32 = vpop.f32.mrb[34].mxu1 }
 0x20f   :  { %v2032_v33 = vpop.f32.mrb[35].mxu1 }
 0x212   :  { %v1078_v34 = vpop.f32.mrb[36].mxu0 }
 0x213   :  { %v1084_v35 = vadd.f32 %v1078_v34, %v1040_v29  ;;  %v2037_v36 = vpop.f32.mrb[37].mxu0 }
 0x214   :  { %v1081_v37 = vpop.f32.mrb[38].mxu0  ;;  %v1121_v46 = vpop.f32.mrb[36].mxu1 }
 0x215   :  { %v2153_v38 = vpop.eup %2152  ;;  %v1127_v39 = vadd.f32 %v1121_v46, %v1084_v35  ;;  %v2038_v40 = vpop.f32.mrb[39].mxu0 }
 0x216   :  { %v2043_v41 = vpop.f32.mrb[37].mxu1  ;;  %v1823_v42 = vadd.f32 -1.0, %v2153_v38 }
 0x217   :  { %v1124_v43 = vpop.f32.mrb[38].mxu1  ;;  %v1128_v45 = vadd.f32 %v1822_v10, %v1127_v39 }
 0x218   :  { %v2044_v44 = vpop.f32.mrb[39].mxu1  ;;  %v875_v20 = vsel %vm870_vm7, %v869_v16, %v1823_v42 }
 0x219   :  { %v1130_v47 = vmin.f32 %v1128_v45, 0.0  ;;  %877 = vst.msk [vmem:[#allocation3] sm:$0xff] %vm876_vm6, %v875_v20  ;;  %vm1129_vm8 = vcmp.gt.f32.partialorder %v1128_v45, 0.0 }
 0x21b   :  { %v1131_v48 = vmul.f32 1.442695, %v1130_v47 }
 0x21c   :  { %v1278_v19 = vpop.f32.mrb[40].mxu1 }
 0x21d   :  { %2154 = vpow2.f32 %v1131_v48  ;;  %v2057_v21 = vpop.f32.mrb[41].mxu1 }
 0x21e   :  { %v1281_v22 = vpop.f32.mrb[42].mxu1 }
 0x21f   :  { %v2058_v23 = vpop.f32.mrb[43].mxu1 }
 0x220   :  { %v878_v55 = vld [vmem:[#allocation3] ss:$2 sm:$0xf]  ;;  %v880_v56 = vld [vmem:[#allocation3 + $0x1] ss:$2 sm:$0xf] }
 0x221   :  { %v881_v57 = vmax.f32 %v878_v55, %v880_v56  ;;  %v2140_v55 = vld [vmem:[%s2557_s1 + $0x70] sm:$0xff]   ;;  %v2141_v56 = vld [vmem:[%s2557_s1 + $0x80] sm:$0xff]  }
 0x223   :  { %v886_v59 = vmul.f32 %v1824_v58, %v881_v57 }
 0x225   :  { %v891_v1 = vadd.f32 %v1825_v62, %v886_v59 }
 0x227   :  { %v2155_v49 = vpop.eup %2154  ;;  %v1147_v5 = vrot.slane %v891_v1, 7  ;;  %v1151_v8 = vrot.slane %v891_v1, 6  ;;  %v1155_v12 = vrot.slane %v891_v1, 5 }
 0x228   :  { %v1831_v50 = vadd.f32 -1.0, %v2155_v49 }
 0x22a   :  { %v1134_v54 = vsel %vm1129_vm8, %v1128_v45, %v1831_v50  ;;  %v2138_v50 = vld [vmem:[%s2557_s1 + $0x68] sm:$0xff]  }
 0x22b   :  { %1135 = vst.msk [vmem:[#allocation3 + $0x8] sm:$0xff] %vm876_vm6, %v1134_v54  ;;  %v2139_v54 = vld [vmem:[%s2557_s1 + $0x78] sm:$0xff]  }
 0x232   :  { %v1137_v60 = vld [vmem:[#allocation3 + $0x8] ss:$2 sm:$0xf]  ;;  %v1139_v61 = vld [vmem:[#allocation3 + $0x9] ss:$2 sm:$0xf] }
 0x233   :  { %v1140_v63 = vmax.f32 %v1137_v60, %v1139_v61 }
 0x235   :  { %v1141_v0 = vmul.f32 %v1824_v58, %v1140_v63 }
 0x237   :  { %v1142_v3 = vadd.f32 %v1825_v62, %v1141_v0 }
 0x239   :  { %v1144_v4 = vrot.slane %v1142_v3, 7  ;;  %v1149_v6 = vrot.slane %v1142_v3, 6  ;;  %v1153_v10 = vrot.slane %v1142_v3, 5  ;;  %v1157_v14 = vrot.slane %v1142_v3, 4 }
 0x23b   :  { %v1159_v7 = vsel %vm32_vm1, %v891_v1, %v1144_v4  ;;  %vm1241_vm1 = vcmask 261120  }
 0x23c   :  { %v1160_v9 = vsel %vm63_vm0, %v1159_v7, %v1147_v5 }
 0x23d   :  { %v1161_v11 = vsel %vm631_vm5, %v1160_v9, %v1149_v6  ;;  %v1840_v6 = vld [vmem:[%s2558_s2 + $0x7] ss:$0 sm:$0xff] }
 0x23e   :  { %v1162_v13 = vsel %vm626_vm10, %v1161_v11, %v1151_v8 }
 0x23f   :  { %v1164_v15 = vsel %vm1163_vm11, %v1162_v13, %v1153_v10 }
 0x240   :  { %v1166_v16 = vsel %vm1165_vm12, %v1164_v15, %v1155_v12 }
 0x241   :  { %v1167_v17 = vsel %vm56_vm9, %v1166_v16, %v1157_v14 }
 0x242   :  { %v1175_v18 = vpack.c.bf16 %v1167_v17, %v1167_v17 }
 0x244   :  { %2048 = vmatmul.mubr.msk.bf16.vlgmr.msra.gmra.mrb[40].mxu0 %vm876_vm6, %v1175_v18 }
 0x245   :  { %2060 = vmatpush3.bf16.msra.mxu0 %v2428_v51  ;;  %2063 = vmatprep.mubr.msk.bf16.mxu0 %vm2197_vm2, %v2196_v2 }
 0x246   :  { %2061 = vmatprep.subr.bf16.mxu0 %v2196_v2 }
 0x249   :  { %2062 = vmatpush3.bf16.msra.mxu0 %v2434_v52 }
 0x24a   :  { %2075 = vmatprep.subr.bf16.mxu0 %v2196_v2 }
 0x317   :  { %v1223_v25 = vpop.f32.mrb[40].mxu0 }
 0x318   :  { %v2474_v26 = vadd.f32 %v1832_v24, %v1223_v25  ;;  %v2049_v27 = vpop.f32.mrb[41].mxu0 }
 0x319   :  { %v1226_v28 = vpop.f32.mrb[42].mxu0 }
 0x31a   :  { %v1284_v29 = vadd.f32 %v1278_v19, %v2474_v26  ;;  %v2050_v30 = vpop.f32.mrb[43].mxu0 }
 0x31c   :  { %2156 = vtanh.f32 %v1284_v29 }
 0x326   :  { %v2157_v31 = vpop.eup %2156 }
 0x327   :  { %v1286_v32 = vpack.c.bf16 %v2157_v31, %v2157_v31 }
 0x329   :  { %2064 = vmatmul.mubr.msk.bf16.vlgmr.msra.gmra.mrb[44].mxu0 %vm1241_vm1, %v1286_v32 }
 0x32a   :  { %2076 = vmatpush3.bf16.msra.mxu0 %v2428_v51  ;;  %2079 = vmatprep.mubr.msk.bf16.mxu0 %vm2197_vm2, %v2196_v2 }
 0x32b   :  { %2077 = vmatprep.subr.bf16.mxu0 %v2196_v2 }
 0x32e   :  { %2078 = vmatpush3.bf16.msra.mxu0 %v2434_v52 }
 0x32f   :  { %2091 = vmatprep.subr.bf16.mxu0 %v2196_v2 }
 0x3fc   :  { %v1324_v33 = vpop.f32.mrb[44].mxu0 }
 0x3fd   :  { %v1331_v34 = vrot.slane %v1324_v33, 6  ;;  %v2065_v35 = vpop.f32.mrb[45].mxu0 }
 0x3fe   :  { %v1327_v36 = vpop.f32.mrb[46].mxu0  ;;  %v2143_v35 = vld [vmem:[%s2557_s1 + $0x90] sm:$0xff]  }
 0x3ff   :  { %v1333_v37 = vadd.f32 %v1331_v34, %v2474_v26  ;;  %v2066_v46 = vpop.f32.mrb[47].mxu0  ;;  %v2142_v34 = vld [vmem:[%s2557_s1 + $0x88] sm:$0xff]   ;;  %s1790_s1 = sshll.u32 %s2199_s20, 4  ;;  %s1791_s1 = int_to_ptr.vmem [resolvable:$true] %s1790_s1 }
 0x400   :  { %s2172_s21 = scalar_lea.vmem %s1791_s1, 32  ;;  %p2177_p1 = scmp.lt.s32.totalorder %s1791_s1, %s1791_s1 }
 0x401   :  { %2158 = vtanh.f32 %v1333_v37  ;;  %p2173_p0 = scmp.ne.s32.totalorder %s1791_s1, %s2172_s21  ;;  %p2178_p2 = scmp.lt.s32.totalorder %s2172_s21, %s2172_s21 }
 0x403   :  { %p2179_p3 = por %p2178_p2, %p2177_p1 }
 0x405   :  { %p2180_p4 = pnand %p2179_p3, %p2173_p0 }
 0x40b   :  { %v2159_v38 = vpop.eup %2158 }
 0x40c   :  { %v1335_v39 = vpack.c.bf16 %v2159_v38, %v2159_v38  ;;  %v1437_v20 = vsel %vm63_vm0, %v2157_v31, %v2159_v38  ;;  %vm1782_vm0 = vcmask 25600  }
 0x40e   :  { %v1337_v51 = vrot.slane %v1335_v39, 1 }
 0x410   :  { %2072 = vmatmul.mubr.msk.bf16.vlgmr.msra.gmra.mrb[44].mxu1 %vm1241_vm1, %v1337_v51 }
 0x411   :  { %2087 = vmatprep.mubr.msk.bf16.mxu1 %vm2197_vm2, %v2196_v2  ;;  %2084 = vmatpush3.bf16.msra.mxu1 %v2138_v50 }
 0x412   :  { %2085 = vmatprep.subr.bf16.mxu1 %v2196_v2 }
 0x415   :  { %2086 = vmatpush3.bf16.msra.mxu1 %v2140_v55 }
 0x416   :  { %2099 = vmatprep.subr.bf16.mxu1 %v2196_v2 }
 0x4e3   :  { %v1375_v40 = vpop.f32.mrb[44].mxu1 }
 0x4e4   :  { %v1382_v52 = vrot.slane %v1375_v40, 4  ;;  %v2073_v41 = vpop.f32.mrb[45].mxu1 }
 0x4e5   :  { %v1378_v42 = vpop.f32.mrb[46].mxu1 }
 0x4e6   :  { %v1384_v43 = vadd.f32 %v1382_v52, %v2474_v26  ;;  %v2074_v45 = vpop.f32.mrb[47].mxu1 }
 0x4e8   :  { %2160 = vtanh.f32 %v1384_v43 }
 0x4f2   :  { %v2161_v44 = vpop.eup %2160 }
 0x4f3   :  { %v1386_v47 = vpack.c.bf16 %v2161_v44, %v2161_v44  ;;  %v1438_v48 = vsel %vm626_vm10, %v1437_v20, %v2161_v44 }
 0x4f5   :  { %v1388_v49 = vrot.slane %v1386_v47, 2 }
 0x4f7   :  { %2080 = vmatmul.mubr.msk.bf16.vlgmr.msra.gmra.mrb[48].mxu0 %vm1241_vm1, %v1388_v49 }
 0x4f8   :  { %2095 = vmatprep.mubr.msk.bf16.mxu0 %vm2197_vm2, %v2196_v2  ;;  %2092 = vmatpush3.bf16.msra.mxu0 %v2139_v54 }
 0x4f9   :  { %2093 = vmatprep.subr.bf16.mxu0 %v2196_v2 }
 0x4fc   :  { %2094 = vmatpush3.bf16.msra.mxu0 %v2141_v56 }
 0x4fd   :  { %2107 = vmatprep.subr.bf16.mxu0 %v2196_v2 }
 0x4ff   :  { %2096 = vmatmul.mubr.bf16.vlgmr.msra.gmra.mrb[52].mxu0 %v2198_v53 }
 0x500   :  { %2108 = vmatpush3.bf16.msra.mxu0 %v2139_v54  ;;  %2111 = vmatprep.mubr.msk.bf16.mxu0 %vm2197_vm2, %v2196_v2 }
 0x501   :  { %2109 = vmatprep.subr.bf16.mxu0 %v2196_v2 }
 0x504   :  { %2110 = vmatpush3.bf16.msra.mxu0 %v2141_v56 }
 0x505   :  { %2123 = vmatprep.subr.bf16.mxu0 %v2196_v2 }
 0x5ca   :  { %v1426_v57 = vpop.f32.mrb[48].mxu0 }
 0x5cb   :  { %v1433_v58 = vrot.slane %v1426_v57, 2  ;;  %v2081_v59 = vpop.f32.mrb[49].mxu0 }
 0x5cc   :  { %v1429_v60 = vpop.f32.mrb[50].mxu0 }
 0x5cd   :  { %v1435_v61 = vadd.f32 %v1433_v58, %v2474_v26  ;;  %v2082_v62 = vpop.f32.mrb[51].mxu0 }
 0x5cf   :  { %2162 = vtanh.f32 %v1435_v61 }
 0x5d2   :  { %v1555_v1 = vpop.f32.mrb[52].mxu0 }
 0x5d3   :  { %v2097_v3 = vpop.f32.mrb[53].mxu0 }
 0x5d4   :  { %v1558_v4 = vpop.f32.mrb[54].mxu0 }
 0x5d5   :  { %v2098_v5 = vpop.f32.mrb[55].mxu0 }
 0x5d9   :  { %v2163_v63 = vpop.eup %2162 }
 0x5da   :  { %v1439_v53 = vsel %vm1165_vm12, %v1438_v48, %v2163_v63 }
 0x5db   :  { %v1449_v0 = vpack.c.bf16 %v1439_v53, %v1439_v53 }
 0x5dd   :  { %2088 = vmatmul.mubr.msk.bf16.vlgmr.msra.gmra.mrb[48].mxu1 %vm1241_vm1, %v1449_v0 }
 0x5de   :  { %2100 = vmatpush3.bf16.msra.mxu1 %v2139_v54  ;;  %2103 = vmatprep.mubr.msk.bf16.mxu1 %vm2197_vm2, %v2196_v2 }
 0x5df   :  { %2101 = vmatprep.subr.bf16.mxu1 %v2196_v2 }
 0x5e2   :  { %2102 = vmatpush3.bf16.msra.mxu1 %v2141_v56 }
 0x5e3   :  { %2115 = vmatprep.subr.bf16.mxu1 %v2196_v2 }
 0x6b0   :  { %v1503_v7 = vpop.f32.mrb[48].mxu1 }
 0x6b1   :  { %v1504_v8 = vadd.f32 %v1840_v6, %v1503_v7  ;;  %v2089_v9 = vpop.f32.mrb[49].mxu1 }
 0x6b2   :  { %v1506_v10 = vpop.f32.mrb[50].mxu1 }
 0x6b3   :  { %v1561_v11 = vadd.f32 %v1555_v1, %v1504_v8  ;;  %v2090_v12 = vpop.f32.mrb[51].mxu1 }
 0x6b5   :  { %2164 = vtanh.f32 %v1561_v11 }
 0x6bf   :  { %v2165_v13 = vpop.eup %2164 }
 0x6c0   :  { %v1563_v14 = vpack.c.bf16 %v2165_v13, %v2165_v13 }
 0x6c2   :  { %2104 = vmatmul.mubr.msk.bf16.vlgmr.msra.gmra.mrb[52].mxu1 %vm1241_vm1, %v1563_v14 }
 0x6c3   :  { %2116 = vmatpush3.bf16.msra.mxu1 %v2139_v54  ;;  %2119 = vmatprep.mubr.msk.bf16.mxu1 %vm2197_vm2, %v2196_v2 }
 0x6c4   :  { %2117 = vmatprep.subr.bf16.mxu1 %v2196_v2 }
 0x6c7   :  { %2118 = vmatpush3.bf16.msra.mxu1 %v2141_v56 }
 0x795   :  { %v1601_v15 = vpop.f32.mrb[52].mxu1 }
 0x796   :  { %v1608_v16 = vrot.slane %v1601_v15, 6  ;;  %v2105_v17 = vpop.f32.mrb[53].mxu1 }
 0x797   :  { %v1604_v18 = vpop.f32.mrb[54].mxu1 }
 0x798   :  { %v1610_v19 = vadd.f32 %v1608_v16, %v1504_v8  ;;  %v2106_v21 = vpop.f32.mrb[55].mxu1 }
 0x79a   :  { %2166 = vtanh.f32 %v1610_v19 }
 0x7a4   :  { %v2167_v22 = vpop.eup %2166 }
 0x7a5   :  { %v1612_v23 = vpack.c.bf16 %v2167_v22, %v2167_v22 }
 0x7a7   :  { %v1614_v24 = vrot.slane %v1612_v23, 1 }
 0x7a9   :  { %2112 = vmatmul.mubr.msk.bf16.vlgmr.msra.gmra.mrb[56].mxu0 %vm1241_vm1, %v1614_v24 }
 0x7aa   :  { %2127 = vmatprep.mubr.msk.bf16.mxu0 %vm2197_vm2, %v2196_v2  ;;  %2124 = vmatpush3.bf16.msra.mxu0 %v2142_v34 }
 0x7ab   :  { %2125 = vmatprep.subr.bf16.mxu0 %v2196_v2  ;;  %v1849_v2 = vld [vmem:[%s2558_s2 + $0x8] ss:$0 sm:$0xff] }
 0x7ae   :  { %2126 = vmatpush3.bf16.msra.mxu0 %v2143_v35 }
 0x87c   :  { %v1652_v25 = vpop.f32.mrb[56].mxu0 }
 0x87d   :  { %v1659_v26 = vrot.slane %v1652_v25, 4  ;;  %v2113_v27 = vpop.f32.mrb[57].mxu0 }
 0x87e   :  { %v1655_v28 = vpop.f32.mrb[58].mxu0 }
 0x87f   :  { %v1661_v29 = vadd.f32 %v1659_v26, %v1504_v8  ;;  %v2114_v30 = vpop.f32.mrb[59].mxu0 }
 0x881   :  { %2168 = vtanh.f32 %v1661_v29 }
 0x88b   :  { %v2169_v31 = vpop.eup %2168 }
 0x88c   :  { %v1663_v32 = vpack.c.bf16 %v2169_v31, %v2169_v31 }
 0x88e   :  { %v1665_v33 = vrot.slane %v1663_v32, 2 }
 0x890   :  { %2120 = vmatmul.mubr.msk.bf16.vlgmr.msra.gmra.mrb[56].mxu1 %vm1241_vm1, %v1665_v33 }
 0x963   :  { %v1703_v36 = vpop.f32.mrb[56].mxu1 }
 0x964   :  { %v1710_v37 = vrot.slane %v1703_v36, 2  ;;  %v2121_v46 = vpop.f32.mrb[57].mxu1 }
 0x965   :  { %v1706_v38 = vpop.f32.mrb[58].mxu1 }
 0x966   :  { %v1712_v39 = vadd.f32 %v1710_v37, %v1504_v8  ;;  %v2122_v51 = vpop.f32.mrb[59].mxu1 }
 0x968   :  { %2170 = vtanh.f32 %v1712_v39 }
 0x972   :  { %v2171_v40 = vpop.eup %2170 }
 0x973   :  { %v1719_v52 = vmax.f32 %v2171_v40, 0.0 }
 0x975   :  { %v1720_v41 = vpack.c.bf16 %v1719_v52, %v1719_v52 }
 0x977   :  { %v1726_v42 = vrot.slane %v1720_v41, 3 }
 0x979   :  { %2128 = vmatmul.mubr.msk.bf16.vlgmr.msra.gmra.mrb[60].mxu0 %vm1241_vm1, %v1726_v42 }
 0xa4c   :  { %v1776_v43 = vpop.f32.mrb[60].mxu0 }
 0xa4d   :  { %v1777_v45 = vadd.f32 %v1849_v2, %v1776_v43  ;;  %v2129_v44 = vpop.f32.mrb[61].mxu0 }
 0xa4e   :  { %v1779_v20 = vpop.f32.mrb[62].mxu0 }
 0xa4f   :  { %v2130_v47 = vpop.f32.mrb[63].mxu0  ;;  %1783 = vst.msk [vmem:[#allocation4] sm:$0x3] %vm1782_vm0, %v1777_v45 }
 0xa50   :  { %2183 = shalt.err (!%p2180_p4)
}
 0xa51   :  { %s2184_s2 = scalar_lea.hbm %s2559_s3, 32 }
 0xa52   :  { %p2185_p5 = scmp.ne.s32.totalorder %s2559_s3, %s2184_s2  ;;  %p2188_p6 = scmp.lt.u32.totalorder %s2184_s2, %s2559_s3 }
 0xa54   :  { %p2190_p7 = pnand %p2188_p6, %p2185_p5 }
 0xa56   :  { %2193 = shalt.err (!%p2190_p7)
}
 0xa57   :  { %1793 = dma.vmem_to_hbm [thread:$0]  %s1791_s1, 32, %s2559_s3, [#allocation5]  }
 0xa58   :  { %2194 = dma.done.wait [#allocation5], 32  }
 0xa59   :  { %2195 = vsyncadd [#allocation5], 4294967264 }
 0xa5a   :  { %1797 = vsyncpa [#allocation5], 1 }

</bundles_post_ra>
